<compile_context>
chip_gen: v6e
topology: v6e:2x2x1
jax: 0.10.0
libtpu: 0.0.40
codegen_flags: <defaults>
</compile_context>

<pallas_src>
import jax
import jax.numpy as jnp
from jax.experimental import pallas as pl
from jax.experimental.pallas import tpu as pltpu


def _round_up(x, m):
    return (x + m - 1) // m * m


# ----------------------------- Pallas kernel ---------------------------------
def _multimodal_head_kernel(
    vision_ref, bert_ref,
    en_sq_ref, en_ex_ref,               # SENet on vision embedding (no bias), bf16, padded to 128
    fus_wv_ref, fus_wb_ref, fus_b_ref,  # fusion Linear split into vision/bert halves (bf16) + f32 bias
    se_sq_ref, se_ex_ref,               # SENet inside ConcatDenseSE (no bias), bf16, padded to 128
    cls_w_ref, cls_b_ref,               # classifier Linear, padded to 256 lanes (bf16 W, f32 b)
    pred_ref,                           # output logits (TB, 256) f32
):
    bf16 = jnp.bfloat16
    f32 = jnp.float32

    # --- self.enhance(vision_embedding)  (SENet) ---
    v = vision_ref[...]                                                      # f32 (TB, Dv)
    g = jnp.dot(v.astype(bf16), en_sq_ref[...], preferred_element_type=f32)  # (TB, 128)
    g = jnp.maximum(g, 0.0)                                                  # ReLU
    g = jnp.dot(g.astype(bf16), en_ex_ref[...], preferred_element_type=f32)  # (TB, Dv)
    v = v * jax.nn.sigmoid(g)                                                # f32 elementwise

    # --- self.fusion([vision_embedding, bert_embedding])  (ConcatDenseSE) ---
    # fusion_dropout is identity in eval mode.
    b = bert_ref[...]                                                        # f32 (TB, Db)
    emb = (jnp.dot(v.astype(bf16), fus_wv_ref[...], preferred_element_type=f32)
           + jnp.dot(b.astype(bf16), fus_wb_ref[...], preferred_element_type=f32)
           + fus_b_ref[...])                                                 # f32 (TB, F)
    g2 = jnp.dot(emb.astype(bf16), se_sq_ref[...], preferred_element_type=f32)
    g2 = jnp.maximum(g2, 0.0)
    g2 = jnp.dot(g2.astype(bf16), se_ex_ref[...], preferred_element_type=f32)
    emb = emb * jax.nn.sigmoid(g2)

    # --- self.classifier(final_embedding) ---  (lane-dense padded output)
    pred_ref[...] = (jnp.dot(emb.astype(bf16), cls_w_ref[...], preferred_element_type=f32)
                     + cls_b_ref[...])


# ------------------------- parameter packing (perf) ---------------------------
def _pad_cols(w, n):
    return jnp.pad(w, ((0, 0), (0, n - w.shape[1])))


def _pad_rows(w, n):
    return jnp.pad(w, ((0, n - w.shape[0]), (0, 0)))


def pack_head_params(p):
    """bf16 weights, 128-aligned SE squeeze dims, 256-padded classifier lanes."""
    bf16 = jnp.bfloat16
    sq_en = _round_up(p["en_sq"].shape[1], 128)
    sq_se = _round_up(p["se_sq"].shape[1], 128)
    c = p["cls_w"].shape[1]
    c_pad = _round_up(c, 128)
    return {
        "en_sq": _pad_cols(p["en_sq"], sq_en).astype(bf16),
        "en_ex": _pad_rows(p["en_ex"], sq_en).astype(bf16),
        "fus_wv": p["fus_wv"].astype(bf16),
        "fus_wb": p["fus_wb"].astype(bf16),
        "fus_b": p["fus_b"].astype(jnp.float32),
        "se_sq": _pad_cols(p["se_sq"], sq_se).astype(bf16),
        "se_ex": _pad_rows(p["se_ex"], sq_se).astype(bf16),
        "cls_w": _pad_cols(p["cls_w"], c_pad).astype(bf16),
        # large-negative pad so argmax over unsliced padded logits would still be safe
        "cls_b": jnp.pad(p["cls_b"].astype(jnp.float32),
                         ((0, 0), (0, c_pad - c)), constant_values=-1e9),
        "num_classes": c,
    }


# ----------------------------- pallas_call wrapper -----------------------------
def multimodal_head(vision_emb, bert_emb, packed, *, tile_b=128):
    B, Dv = vision_emb.shape
    Db = bert_emb.shape[1]
    C = packed["num_classes"]
    Cp = packed["cls_w"].shape[1]

    # batch tile: at least 8 (sublane), at most tile_b; pad batch to a multiple of TB
    TB = min(tile_b, _round_up(B, 8))
    Bp = _round_up(B, TB)
    if Bp != B:
        vision_emb = jnp.pad(vision_emb, ((0, Bp - B), (0, 0)))
        bert_emb = jnp.pad(bert_emb, ((0, Bp - B), (0, 0)))

    w_keys = ("en_sq", "en_ex", "fus_wv", "fus_wb", "fus_b",
              "se_sq", "se_ex", "cls_w", "cls_b")
    weights = [packed[k] for k in w_keys]

    def weight_spec(w):
        # same block every grid step -> weight stays VMEM-resident (no re-DMA)
        return pl.BlockSpec(w.shape, lambda i: (0, 0))

    out = pl.pallas_call(
        _multimodal_head_kernel,
        out_shape=jax.ShapeDtypeStruct((Bp, Cp), jnp.float32),
        grid_spec=pltpu.PrefetchScalarGridSpec(
            num_scalar_prefetch=0,
            grid=(Bp // TB,),
            in_specs=[pl.BlockSpec((TB, Dv), lambda i: (i, 0)),
                      pl.BlockSpec((TB, Db), lambda i: (i, 0))]
                     + [weight_spec(w) for w in weights],
            out_specs=pl.BlockSpec((TB, Cp), lambda i: (i, 0)),
        ),
        compiler_params=pltpu.CompilerParams(
            dimension_semantics=("parallel",)),  # v7x: shard batch tiles across 2 TCs
    )(vision_emb, bert_emb, *weights)

    # slice off batch padding and padded logit lanes
    return out[:B, :C]


# ----------------------------- plain-JAX glue ---------------------------------
def bert_pooler_stub(doc_input, doc_mask, p):
    # TODO(synk): BertModel.from_pretrained (full pretrained transformer) has no clean
    # in-script equivalent; stand-in pooler = masked-mean token embeddings -> dense -> tanh.
    tok = p["bert_embed"][doc_input]                                  # (B, L, 768)
    m = doc_mask.astype(jnp.float32)[..., None]                       # (B, L, 1)
    mean = jnp.sum(tok * m, axis=1) / jnp.maximum(jnp.sum(m, axis=1), 1.0)
    return jnp.tanh(mean @ p["bert_pool_w"] + p["bert_pool_b"])       # (B, 768)


def nextvlad_stub(frame_input, frame_mask, p):
    # TODO(synk): NeXtVLAD source not provided; stand-in = masked-mean frame features -> Linear.
    # (Folding this dense + the bert pooler dense into the Pallas kernel would raise MXU
    #  fill further, but they are stand-ins, so they stay as plain-JAX glue here.)
    m = frame_mask.astype(jnp.float32)[..., None]                     # (B, F, 1)
    mean = jnp.sum(frame_input * m, axis=1) / jnp.maximum(jnp.sum(m, axis=1), 1.0)
    return mean @ p["vlad_w"] + p["vlad_b"]                           # (B, vlad_hidden)


def cal_loss(prediction, label):
    label = jnp.squeeze(label, axis=1)
    logp = jax.nn.log_softmax(prediction, axis=1)
    loss = -jnp.mean(jnp.take_along_axis(logp, label[:, None], axis=1)[:, 0])
    pred_label_id = jnp.argmax(prediction, axis=1)
    accuracy = jnp.sum((label == pred_label_id).astype(jnp.float32)) / label.shape[0]
    return loss, accuracy, pred_label_id, label


def multimodal_forward(inputs, params, packed, inference=False):
    bert_embedding = bert_pooler_stub(inputs["doc_input"], inputs["doc_mask"], params)
    vision_embedding = nextvlad_stub(inputs["frame_input"], inputs["frame_mask"], params)
    prediction = multimodal_head(vision_embedding, bert_embedding, packed)
    if inference:
        return jnp.argmax(prediction, axis=1)
    return cal_loss(prediction, inputs["label"])


# ------------------------- references (sanity checks) --------------------------
def _head_ref_f32(v, b, p):
    """Pure-f32 reference (original module semantics)."""
    g = jax.nn.sigmoid(jnp.maximum(v @ p["en_sq"], 0.0) @ p["en_ex"])
    v = v * g
    emb = v @ p["fus_wv"] + b @ p["fus_wb"] + p["fus_b"]
    g2 = jax.nn.sigmoid(jnp.maximum(emb @ p["se_sq"], 0.0) @ p["se_ex"])
    emb = emb * g2
    return emb @ p["cls_w"] + p["cls_b"]


def _head_ref_bf16(v, b, p):
    """Reference emulating the kernel's bf16-operand / f32-accumulate dots."""
    bf16, f32 = jnp.bfloat16, jnp.float32

    def dot(x, w):
        return jnp.dot(x.astype(bf16), w.astype(bf16), preferred_element_type=f32)

    g = jax.nn.sigmoid(dot(jnp.maximum(dot(v, p["en_sq"]), 0.0), p["en_ex"]))
    v = v * g
    emb = dot(v, p["fus_wv"]) + dot(b, p["fus_wb"]) + p["fus_b"]
    g2 = jax.nn.sigmoid(dot(jnp.maximum(dot(emb, p["se_sq"]), 0.0), p["se_ex"]))
    emb = emb * g2
    return dot(emb, p["cls_w"]) + p["cls_b"]


# ----------------------------- setup / main -----------------------------------
def init_params(key, *, vocab=1000, bert_hidden=768, vlad_hidden=256,
                frame_emb=64, fc_size=256, se_ratio=8, num_classes=200):
    ks = jax.random.split(key, 16)
    s = 0.02
    return {
        # bert stub
        "bert_embed": jax.random.normal(ks[0], (vocab, bert_hidden), jnp.float32) * s,
        "bert_pool_w": jax.random.normal(ks[1], (bert_hidden, bert_hidden), jnp.float32) * s,
        "bert_pool_b": jnp.zeros((bert_hidden,), jnp.float32),
        # nextvlad stub
        "vlad_w": jax.random.normal(ks[2], (frame_emb, vlad_hidden), jnp.float32) * s,
        "vlad_b": jnp.zeros((vlad_hidden,), jnp.float32),
        # SENet enhance on vision embedding (Linear bias=False)
        "en_sq": jax.random.normal(ks[3], (vlad_hidden, vlad_hidden // se_ratio), jnp.float32) * s,
        "en_ex": jax.random.normal(ks[4], (vlad_hidden // se_ratio, vlad_hidden), jnp.float32) * s,
        # ConcatDenseSE.fusion Linear (in = vlad_hidden + 768), split into two halves
        "fus_wv": jax.random.normal(ks[5], (vlad_hidden, fc_size), jnp.float32) * s,
        "fus_wb": jax.random.normal(ks[6], (bert_hidden, fc_size), jnp.float32) * s,
        "fus_b": jax.random.normal(ks[7], (1, fc_size), jnp.float32) * s,
        # ConcatDenseSE.enhance SENet
        "se_sq": jax.random.normal(ks[8], (fc_size, fc_size // se_ratio), jnp.float32) * s,
        "se_ex": jax.random.normal(ks[9], (fc_size // se_ratio, fc_size), jnp.float32) * s,
        # classifier
        "cls_w": jax.random.normal(ks[10], (fc_size, num_classes), jnp.float32) * s,
        "cls_b": jnp.zeros((1, num_classes), jnp.float32),
    }


if __name__ == "__main__":
    key = jax.random.PRNGKey(0)
    B, L, F, FRAME_EMB, NUM_CLASSES = 8, 8, 8, 64, 200

    params = init_params(key, frame_emb=FRAME_EMB, num_classes=NUM_CLASSES)
    packed = pack_head_params(params)

    k1, k2, k3, k4 = jax.random.split(jax.random.PRNGKey(0), 4)
    inputs = {
        "doc_input": jax.random.randint(k1, (B, L), 0, 1000, dtype=jnp.int32),
        "doc_mask": jnp.ones((B, L), jnp.int32),
        "frame_input": jax.random.normal(k2, (B, F, FRAME_EMB), jnp.float32),
        "frame_mask": jnp.ones((B, F), jnp.int32),
        "label": jax.random.randint(k3, (B, 1), 0, NUM_CLASSES, dtype=jnp.int32),
    }

    # training-style path returning (loss, accuracy, pred_label_id, label)
    loss, acc, pred_id, label = jax.block_until_ready(
        multimodal_forward(inputs, params, packed))

    # sanity-check the Pallas head
    v_emb = nextvlad_stub(inputs["frame_input"], inputs["frame_mask"], params)
    b_emb = bert_pooler_stub(inputs["doc_input"], inputs["doc_mask"], params)
    got = jax.block_until_ready(multimodal_head(v_emb, b_emb, packed))
    assert got.shape == (B, NUM_CLASSES)

    # tight check vs a reference that emulates bf16-operand / f32-accumulate dots
    want_bf16 = _head_ref_bf16(v_emb, b_emb, params)
    assert jnp.allclose(got, want_bf16, atol=1e-4, rtol=1e-3), \
        "Pallas head mismatch vs bf16-emulating reference"

    # loose check vs the pure-f32 module semantics (bf16 weight quantization error only)
    want_f32 = _head_ref_f32(v_emb, b_emb, params)
    assert jnp.allclose(got, want_f32, atol=2e-2, rtol=5e-2), \
        "Pallas head mismatch vs f32 reference"

    # inference-style path (argmax over the sliced 200-class logits)
    inf = jax.block_until_ready(multimodal_forward(inputs, params, packed, inference=True))
    assert inf.shape == (B,)

    print("KERNEL_OK")
</pallas_src>

<mosaic_0001>
module attributes {stable_mosaic.version = 11 : i64} {
  func.func @_multimodal_head_kernel(%arg0: i32, %arg1: memref<8x256xf32, #tpu.memory_space<vmem>>, %arg2: memref<8x768xf32, #tpu.memory_space<vmem>>, %arg3: memref<256x128xbf16, #tpu.memory_space<vmem>>, %arg4: memref<128x256xbf16, #tpu.memory_space<vmem>>, %arg5: memref<256x256xbf16, #tpu.memory_space<vmem>>, %arg6: memref<768x256xbf16, #tpu.memory_space<vmem>>, %arg7: memref<1x256xf32, #tpu.memory_space<vmem>>, %arg8: memref<256x128xbf16, #tpu.memory_space<vmem>>, %arg9: memref<128x256xbf16, #tpu.memory_space<vmem>>, %arg10: memref<256x256xbf16, #tpu.memory_space<vmem>>, %arg11: memref<1x256xf32, #tpu.memory_space<vmem>>, %arg12: memref<8x256xf32, #tpu.memory_space<vmem>>) attributes {dimension_semantics = [#tpu.dimension_semantics<parallel>], iteration_bounds = array<i64: 1>, scalar_prefetch = 0 : i64, scratch_operands = 0 : i64, tpu.core_type = #tpu.core_type<tc>, window_params = [{transform_indices = @transform_0, window_bounds = array<i64: 8, 256>}, {transform_indices = @transform_1, window_bounds = array<i64: 8, 768>}, {pipeline_mode = #tpu.pipeline_mode<synchronous>, transform_indices = @transform_2, window_bounds = array<i64: 256, 128>}, {pipeline_mode = #tpu.pipeline_mode<synchronous>, transform_indices = @transform_3, window_bounds = array<i64: 128, 256>}, {pipeline_mode = #tpu.pipeline_mode<synchronous>, transform_indices = @transform_4, window_bounds = array<i64: 256, 256>}, {pipeline_mode = #tpu.pipeline_mode<synchronous>, transform_indices = @transform_5, window_bounds = array<i64: 768, 256>}, {pipeline_mode = #tpu.pipeline_mode<synchronous>, transform_indices = @transform_6, window_bounds = array<i64: 1, 256>}, {pipeline_mode = #tpu.pipeline_mode<synchronous>, transform_indices = @transform_7, window_bounds = array<i64: 256, 128>}, {pipeline_mode = #tpu.pipeline_mode<synchronous>, transform_indices = @transform_8, window_bounds = array<i64: 128, 256>}, {pipeline_mode = #tpu.pipeline_mode<synchronous>, transform_indices = @transform_9, window_bounds = array<i64: 256, 256>}, {pipeline_mode = #tpu.pipeline_mode<synchronous>, transform_indices = @transform_10, window_bounds = array<i64: 1, 256>}, {transform_indices = @transform_11, window_bounds = array<i64: 8, 256>}]} {
    %c0 = arith.constant 0 : index
    %c0_0 = arith.constant 0 : index
    %0 = vector.load %arg1[%c0, %c0_0] : memref<8x256xf32, #tpu.memory_space<vmem>>, vector<8x256xf32>
    %1 = arith.truncf %0 : vector<8x256xf32> to vector<8x256xbf16>
    %c0_1 = arith.constant 0 : index
    %c0_2 = arith.constant 0 : index
    %2 = vector.load %arg3[%c0_1, %c0_2] : memref<256x128xbf16, #tpu.memory_space<vmem>>, vector<256x128xbf16>
    %cst = arith.constant dense<0.000000e+00> : vector<8x128xf32>
    %3 = tpu.matmul %1, %2, %cst {dimension_numbers = #tpu.dot_dimension_numbers<[1], [0], [0], [1], [0, 0, 1, 1], [], []>} : vector<8x256xbf16>, vector<256x128xbf16>, vector<8x128xf32> -> vector<8x128xf32>
    %cst_3 = arith.constant 0.000000e+00 : f32
    %4 = vector.broadcast %cst_3 : f32 to vector<8x128xf32>
    %5 = arith.maximumf %3, %4 : vector<8x128xf32>
    %6 = arith.truncf %5 : vector<8x128xf32> to vector<8x128xbf16>
    %c0_4 = arith.constant 0 : index
    %c0_5 = arith.constant 0 : index
    %7 = vector.load %arg4[%c0_4, %c0_5] : memref<128x256xbf16, #tpu.memory_space<vmem>>, vector<128x256xbf16>
    %cst_6 = arith.constant dense<0.000000e+00> : vector<8x256xf32>
    %8 = tpu.matmul %6, %7, %cst_6 {dimension_numbers = #tpu.dot_dimension_numbers<[1], [0], [0], [1], [0, 0, 1, 1], [], []>} : vector<8x128xbf16>, vector<128x256xbf16>, vector<8x256xf32> -> vector<8x256xf32>
    %9 = arith.negf %8 : vector<8x256xf32>
    %10 = math.exp %9 : vector<8x256xf32>
    %cst_7 = arith.constant 1.000000e+00 : f32
    %11 = vector.broadcast %cst_7 : f32 to vector<8x256xf32>
    %12 = arith.addf %11, %10 : vector<8x256xf32>
    %13 = arith.divf %11, %12 : vector<8x256xf32>
    %14 = arith.mulf %0, %13 : vector<8x256xf32>
    %c0_8 = arith.constant 0 : index
    %c0_9 = arith.constant 0 : index
    %15 = vector.load %arg2[%c0_8, %c0_9] : memref<8x768xf32, #tpu.memory_space<vmem>>, vector<8x768xf32>
    %16 = arith.truncf %14 : vector<8x256xf32> to vector<8x256xbf16>
    %c0_10 = arith.constant 0 : index
    %c0_11 = arith.constant 0 : index
    %17 = vector.load %arg5[%c0_10, %c0_11] : memref<256x256xbf16, #tpu.memory_space<vmem>>, vector<256x256xbf16>
    %cst_12 = arith.constant dense<0.000000e+00> : vector<8x256xf32>
    %18 = tpu.matmul %16, %17, %cst_12 {dimension_numbers = #tpu.dot_dimension_numbers<[1], [0], [0], [1], [0, 0, 1, 1], [], []>} : vector<8x256xbf16>, vector<256x256xbf16>, vector<8x256xf32> -> vector<8x256xf32>
    %19 = arith.truncf %15 : vector<8x768xf32> to vector<8x768xbf16>
    %c0_13 = arith.constant 0 : index
    %c0_14 = arith.constant 0 : index
    %20 = vector.load %arg6[%c0_13, %c0_14] : memref<768x256xbf16, #tpu.memory_space<vmem>>, vector<768x256xbf16>
    %cst_15 = arith.constant dense<0.000000e+00> : vector<8x256xf32>
    %21 = tpu.matmul %19, %20, %cst_15 {dimension_numbers = #tpu.dot_dimension_numbers<[1], [0], [0], [1], [0, 0, 1, 1], [], []>} : vector<8x768xbf16>, vector<768x256xbf16>, vector<8x256xf32> -> vector<8x256xf32>
    %22 = arith.addf %18, %21 : vector<8x256xf32>
    %c0_16 = arith.constant 0 : index
    %c0_17 = arith.constant 0 : index
    %23 = vector.load %arg7[%c0_16, %c0_17] : memref<1x256xf32, #tpu.memory_space<vmem>>, vector<1x256xf32>
    %24 = vector.broadcast %23 : vector<1x256xf32> to vector<8x256xf32>
    %25 = arith.addf %22, %24 : vector<8x256xf32>
    %26 = arith.truncf %25 : vector<8x256xf32> to vector<8x256xbf16>
    %c0_18 = arith.constant 0 : index
    %c0_19 = arith.constant 0 : index
    %27 = vector.load %arg8[%c0_18, %c0_19] : memref<256x128xbf16, #tpu.memory_space<vmem>>, vector<256x128xbf16>
    %cst_20 = arith.constant dense<0.000000e+00> : vector<8x128xf32>
    %28 = tpu.matmul %26, %27, %cst_20 {dimension_numbers = #tpu.dot_dimension_numbers<[1], [0], [0], [1], [0, 0, 1, 1], [], []>} : vector<8x256xbf16>, vector<256x128xbf16>, vector<8x128xf32> -> vector<8x128xf32>
    %cst_21 = arith.constant 0.000000e+00 : f32
    %29 = vector.broadcast %cst_21 : f32 to vector<8x128xf32>
    %30 = arith.maximumf %28, %29 : vector<8x128xf32>
    %31 = arith.truncf %30 : vector<8x128xf32> to vector<8x128xbf16>
    %c0_22 = arith.constant 0 : index
    %c0_23 = arith.constant 0 : index
    %32 = vector.load %arg9[%c0_22, %c0_23] : memref<128x256xbf16, #tpu.memory_space<vmem>>, vector<128x256xbf16>
    %cst_24 = arith.constant dense<0.000000e+00> : vector<8x256xf32>
    %33 = tpu.matmul %31, %32, %cst_24 {dimension_numbers = #tpu.dot_dimension_numbers<[1], [0], [0], [1], [0, 0, 1, 1], [], []>} : vector<8x128xbf16>, vector<128x256xbf16>, vector<8x256xf32> -> vector<8x256xf32>
    %34 = arith.negf %33 : vector<8x256xf32>
    %35 = math.exp %34 : vector<8x256xf32>
    %cst_25 = arith.constant 1.000000e+00 : f32
    %36 = vector.broadcast %cst_25 : f32 to vector<8x256xf32>
    %37 = arith.addf %36, %35 : vector<8x256xf32>
    %38 = arith.divf %36, %37 : vector<8x256xf32>
    %39 = arith.mulf %25, %38 : vector<8x256xf32>
    %40 = arith.truncf %39 : vector<8x256xf32> to vector<8x256xbf16>
    %c0_26 = arith.constant 0 : index
    %c0_27 = arith.constant 0 : index
    %41 = vector.load %arg10[%c0_26, %c0_27] : memref<256x256xbf16, #tpu.memory_space<vmem>>, vector<256x256xbf16>
    %cst_28 = arith.constant dense<0.000000e+00> : vector<8x256xf32>
    %42 = tpu.matmul %40, %41, %cst_28 {dimension_numbers = #tpu.dot_dimension_numbers<[1], [0], [0], [1], [0, 0, 1, 1], [], []>} : vector<8x256xbf16>, vector<256x256xbf16>, vector<8x256xf32> -> vector<8x256xf32>
    %c0_29 = arith.constant 0 : index
    %c0_30 = arith.constant 0 : index
    %43 = vector.load %arg11[%c0_29, %c0_30] : memref<1x256xf32, #tpu.memory_space<vmem>>, vector<1x256xf32>
    %44 = vector.broadcast %43 : vector<1x256xf32> to vector<8x256xf32>
    %45 = arith.addf %42, %44 : vector<8x256xf32>
    %c0_31 = arith.constant 0 : index
    %c0_32 = arith.constant 0 : index
    %46 = vector.load %arg12[%c0_31, %c0_32] : memref<8x256xf32, #tpu.memory_space<vmem>>, vector<8x256xf32>
    tpu.vector_store %arg12[%c0_31, %c0_32], %45 {strides = array<i32>} : memref<8x256xf32, #tpu.memory_space<vmem>>, vector<8x256xf32>,
    return
  }
  func.func @transform_0(%arg0: i32) -> (i32, i32) {
    %c0_i32 = arith.constant 0 : i32
    %c0_i32_0 = arith.constant 0 : i32
    return %arg0, %c0_i32 : i32, i32
  }
  func.func @transform_1(%arg0: i32) -> (i32, i32) {
    %c0_i32 = arith.constant 0 : i32
    %c0_i32_0 = arith.constant 0 : i32
    return %arg0, %c0_i32 : i32, i32
  }
  func.func @transform_2(%arg0: i32) -> (i32, i32) {
    %c0_i32 = arith.constant 0 : i32
    %c0_i32_0 = arith.constant 0 : i32
    %c0_i32_1 = arith.constant 0 : i32
    return %c0_i32, %c0_i32_0 : i32, i32
  }
  func.func @transform_3(%arg0: i32) -> (i32, i32) {
    %c0_i32 = arith.constant 0 : i32
    %c0_i32_0 = arith.constant 0 : i32
    %c0_i32_1 = arith.constant 0 : i32
    return %c0_i32, %c0_i32_0 : i32, i32
  }
  func.func @transform_4(%arg0: i32) -> (i32, i32) {
    %c0_i32 = arith.constant 0 : i32
    %c0_i32_0 = arith.constant 0 : i32
    %c0_i32_1 = arith.constant 0 : i32
    return %c0_i32, %c0_i32_0 : i32, i32
  }
  func.func @transform_5(%arg0: i32) -> (i32, i32) {
    %c0_i32 = arith.constant 0 : i32
    %c0_i32_0 = arith.constant 0 : i32
    %c0_i32_1 = arith.constant 0 : i32
    return %c0_i32, %c0_i32_0 : i32, i32
  }
  func.func @transform_6(%arg0: i32) -> (i32, i32) {
    %c0_i32 = arith.constant 0 : i32
    %c0_i32_0 = arith.constant 0 : i32
    %c0_i32_1 = arith.constant 0 : i32
    return %c0_i32, %c0_i32_0 : i32, i32
  }
  func.func @transform_7(%arg0: i32) -> (i32, i32) {
    %c0_i32 = arith.constant 0 : i32
    %c0_i32_0 = arith.constant 0 : i32
    %c0_i32_1 = arith.constant 0 : i32
    return %c0_i32, %c0_i32_0 : i32, i32
  }
  func.func @transform_8(%arg0: i32) -> (i32, i32) {
    %c0_i32 = arith.constant 0 : i32
    %c0_i32_0 = arith.constant 0 : i32
    %c0_i32_1 = arith.constant 0 : i32
    return %c0_i32, %c0_i32_0 : i32, i32
  }
  func.func @transform_9(%arg0: i32) -> (i32, i32) {
    %c0_i32 = arith.constant 0 : i32
    %c0_i32_0 = arith.constant 0 : i32
    %c0_i32_1 = arith.constant 0 : i32
    return %c0_i32, %c0_i32_0 : i32, i32
  }
  func.func @transform_10(%arg0: i32) -> (i32, i32) {
    %c0_i32 = arith.constant 0 : i32
    %c0_i32_0 = arith.constant 0 : i32
    %c0_i32_1 = arith.constant 0 : i32
    return %c0_i32, %c0_i32_0 : i32, i32
  }
  func.func @transform_11(%arg0: i32) -> (i32, i32) {
    %c0_i32 = arith.constant 0 : i32
    %c0_i32_0 = arith.constant 0 : i32
    return %arg0, %c0_i32 : i32, i32
  }
}

</mosaic_0001>

<bundles_post_ra>
// kernel: tpu_custom_call.1
= control target key start
LH: loop header
LB: loop body
LE: loop exit
PB: predicated region body
PF: predicated region fallthrough
CT: control target
= control target key end

     0   :  { %16 = vsyncpa [#allocation3], 0  ;;  %s3021_s0 = inlined_call_operand.hbm [shape: f32[8,256], index: 0, kind: input, shape index: {}]   ;;  %s3022_s1 = inlined_call_operand.hbm [shape: f32[8,768], index: 1, kind: input, shape index: {}]   ;;  %s3023_s2 = inlined_call_operand.hbm [shape: bf16[256,128], index: 2, kind: input, shape index: {}]   ;;  %s3024_s3 = inlined_call_operand.hbm [shape: bf16[128,256], index: 3, kind: input, shape index: {}]   ;;  %s3025_s4 = inlined_call_operand.hbm [shape: bf16[256,256], index: 4, kind: input, shape index: {}]   ;;  %s3026_s5 = inlined_call_operand.hbm [shape: bf16[768,256], index: 5, kind: input, shape index: {}]   ;;  %s3027_s6 = inlined_call_operand.vmem [shape: f32[1,256], index: 6, kind: input, shape index: {}]   ;;  %s3028_s7 = inlined_call_operand.hbm [shape: bf16[256,128], index: 7, kind: input, shape index: {}]   ;;  %s3029_s8 = inlined_call_operand.hbm [shape: bf16[128,256], index: 8, kind: input, shape index: {}]   ;;  %s3030_s9 = inlined_call_operand.hbm [shape: bf16[256,256], index: 9, kind: input, shape index: {}]   ;;  %s3031_s10 = inlined_call_operand.vmem [shape: f32[1,256], index: 10, kind: input, shape index: {}]   ;;  %s3032_s11 = inlined_call_operand.hbm [shape: f32[8,256], index: 11, kind: output, shape index: {}]  }
   0x1   :  { %17 = vsyncpa [#allocation6], 0 }
   0x2   :  { %18 = vsyncpa [#allocation9], 0 }
   0x3   :  { %19 = vsyncpa [#allocation12], 0 }
   0x4   :  { %20 = vsyncpa [#allocation15], 0 }
   0x5   :  { %21 = vsyncpa [#allocation4], 0  ;;  %s2871_s17 = smov [#allocation5]   ;;  %s2872_s19 = smov [#allocation8]  }
   0x6   :  { %s38_s18 = sshll.u32 %s2871_s17, 4  ;;  %s59_s20 = sshll.u32 %s2872_s19, 4  ;;  %s39_s18 = int_to_ptr.vmem [resolvable:$true] %s38_s18  ;;  %s60_s20 = int_to_ptr.vmem [resolvable:$true] %s59_s20 }
   0x7   :  { %s2667_s21 = scalar_lea.vmem %s39_s18, 768  ;;  %p2672_p1 = scmp.lt.s32.totalorder %s39_s18, %s39_s18 }
   0x8   :  { %p2668_p0 = scmp.ne.s32.totalorder %s39_s18, %s2667_s21  ;;  %p2673_p2 = scmp.lt.s32.totalorder %s2667_s21, %s2667_s21 }
   0xa   :  { %p2674_p3 = por %p2673_p2, %p2672_p1 }
   0xc   :  { %p2675_p4 = pnand %p2674_p3, %p2668_p0 }
   0xe   :  { %2678 = shalt.err (!%p2675_p4)
}
   0xf   :  { %41 = dma.hbm_to_vmem [thread:$0]  %s3022_s1, 768, %s39_s18, [#allocation6]  }
  0x10   :  { %s2687_s24 = scalar_lea.vmem %s60_s20, 2048  ;;  %p2692_p6 = scmp.lt.s32.totalorder %s60_s20, %s60_s20 }
  0x11   :  { %p2688_p5 = scmp.ne.s32.totalorder %s60_s20, %s2687_s24  ;;  %p2693_p7 = scmp.lt.s32.totalorder %s2687_s24, %s2687_s24 }
  0x13   :  { %p2694_p8 = por %p2693_p7, %p2692_p6 }
  0x15   :  { %p2695_p9 = pnand %p2694_p8, %p2688_p5 }
  0x17   :  { %2698 = shalt.err (!%p2695_p9)
}
  0x18   :  { %s2873_s25 = smov 128   ;;  %s2874_s26 = smov 8  }
  0x19   :  { %65 = dma.hbm_to_vmem [thread:$0]  %s3024_s3, 2048, %s60_s20, [#allocation9], %s2873_s25, %s2873_s25, %s2874_s26  }
  0x1a   :  { %s2875_s29 = smov [#allocation11]   ;;  %s2876_s12 = smov [#allocation14]  }
  0x1b   :  { %s83_s30 = sshll.u32 %s2875_s29, 4  ;;  %s109_s1 = sshll.u32 %s2876_s12, 4  ;;  %s84_s30 = int_to_ptr.vmem [resolvable:$true] %s83_s30  ;;  %s110_s1 = int_to_ptr.vmem [resolvable:$true] %s109_s1 }
  0x1c   :  { %s2707_s13 = scalar_lea.vmem %s84_s30, 12288  ;;  %p2712_p11 = scmp.lt.s32.totalorder %s84_s30, %s84_s30 }
  0x1d   :  { %p2708_p10 = scmp.ne.s32.totalorder %s84_s30, %s2707_s13  ;;  %p2713_p12 = scmp.lt.s32.totalorder %s2707_s13, %s2707_s13 }
  0x1f   :  { %p2714_p13 = por %p2713_p12, %p2712_p11 }
  0x21   :  { %p2715_p0 = pnand %p2714_p13, %p2708_p10 }
  0x23   :  { %2718 = shalt.err (!%p2715_p0)
}
  0x24   :  { %89 = dma.hbm_to_vmem [thread:$0]  %s3026_s5, 12288, %s84_s30, [#allocation12], %s2873_s25, %s2873_s25, %s2874_s26  }
  0x25   :  { %s2727_s3 = scalar_lea.vmem %s110_s1, 2048  ;;  %p2732_p2 = scmp.lt.s32.totalorder %s110_s1, %s110_s1 }
  0x26   :  { %p2728_p1 = scmp.ne.s32.totalorder %s110_s1, %s2727_s3  ;;  %p2733_p3 = scmp.lt.s32.totalorder %s2727_s3, %s2727_s3 }
  0x28   :  { %p2734_p4 = por %p2733_p3, %p2732_p2 }
  0x2a   :  { %p2735_p5 = pnand %p2734_p4, %p2728_p1 }
  0x2c   :  { %2738 = shalt.err (!%p2735_p5)
}
  0x2d   :  { %115 = dma.hbm_to_vmem [thread:$0]  %s3029_s8, 2048, %s110_s1, [#allocation15], %s2873_s25, %s2873_s25, %s2874_s26  }
  0x2e   :  { %s2877_s18 = smov [#allocation2]   ;;  %s2878_s20 = smov [#allocation7]  }
  0x2f   :  { %s28_s19 = sshll.u32 %s2877_s18, 4  ;;  %s47_s21 = sshll.u32 %s2878_s20, 4  ;;  %s29_s19 = int_to_ptr.vmem [resolvable:$true] %s28_s19  ;;  %s48_s21 = int_to_ptr.vmem [resolvable:$true] %s47_s21 }
  0x30   :  { %s2747_s5 = scalar_lea.vmem %s29_s19, 256  ;;  %p2752_p7 = scmp.lt.s32.totalorder %s29_s19, %s29_s19 }
  0x31   :  { %p2748_p6 = scmp.ne.s32.totalorder %s29_s19, %s2747_s5  ;;  %p2753_p8 = scmp.lt.s32.totalorder %s2747_s5, %s2747_s5 }
  0x33   :  { %p2754_p9 = por %p2753_p8, %p2752_p7 }
  0x35   :  { %p2755_p10 = pnand %p2754_p9, %p2748_p6 }
  0x37   :  { %2758 = shalt.err (!%p2755_p10)
}
  0x38   :  { %31 = dma.hbm_to_vmem [thread:$0]  %s3021_s0, 256, %s29_s19, [#allocation3]  }
  0x39   :  { %s2767_s24 = scalar_lea.vmem %s48_s21, 2048  ;;  %p2772_p12 = scmp.lt.s32.totalorder %s48_s21, %s48_s21 }
  0x3a   :  { %p2768_p11 = scmp.ne.s32.totalorder %s48_s21, %s2767_s24  ;;  %p2773_p13 = scmp.lt.s32.totalorder %s2767_s24, %s2767_s24 }
  0x3c   :  { %p2774_p0 = por %p2773_p13, %p2772_p12 }
  0x3e   :  { %p2775_p1 = pnand %p2774_p0, %p2768_p11 }
  0x40   :  { %2778 = shalt.err (!%p2775_p1)
}
  0x41   :  { %s2879_s8 = smov 64   ;;  %s2880_s27 = smov 4  }
  0x42   :  { %53 = dma.hbm_to_vmem [thread:$0]  %s3023_s2, 2048, %s48_s21, [#allocation6], %s2879_s8, %s2879_s8, %s2880_s27  }
  0x43   :  { %s2881_s30 = smov [#allocation10]   ;;  %s2882_s1 = smov [#allocation13]  }
  0x44   :  { %s71_s12 = sshll.u32 %s2881_s30, 4  ;;  %s97_s13 = sshll.u32 %s2882_s1, 4  ;;  %s72_s12 = int_to_ptr.vmem [resolvable:$true] %s71_s12  ;;  %s98_s13 = int_to_ptr.vmem [resolvable:$true] %s97_s13 }
  0x45   :  { %s2787_s0 = scalar_lea.vmem %s72_s12, 4096  ;;  %p2792_p3 = scmp.lt.s32.totalorder %s72_s12, %s72_s12 }
  0x46   :  { %p2788_p2 = scmp.ne.s32.totalorder %s72_s12, %s2787_s0  ;;  %p2793_p4 = scmp.lt.s32.totalorder %s2787_s0, %s2787_s0 }
  0x48   :  { %p2794_p5 = por %p2793_p4, %p2792_p3 }
  0x4a   :  { %p2795_p6 = pnand %p2794_p5, %p2788_p2 }
  0x4c   :  { %2798 = shalt.err (!%p2795_p6)
}
  0x4d   :  { %77 = dma.hbm_to_vmem [thread:$0]  %s3025_s4, 4096, %s72_s12, [#allocation9], %s2873_s25, %s2873_s25, %s2874_s26  }
  0x4e   :  { %s2807_s2 = scalar_lea.vmem %s98_s13, 2048  ;;  %p2812_p8 = scmp.lt.s32.totalorder %s98_s13, %s98_s13 }
  0x4f   :  { %p2808_p7 = scmp.ne.s32.totalorder %s98_s13, %s2807_s2  ;;  %p2813_p9 = scmp.lt.s32.totalorder %s2807_s2, %s2807_s2 }
  0x51   :  { %p2814_p10 = por %p2813_p9, %p2812_p8 }
  0x53   :  { %p2815_p11 = pnand %p2814_p10, %p2808_p7 }
  0x55   :  { %2818 = shalt.err (!%p2815_p11)
}
  0x56   :  { %103 = dma.hbm_to_vmem [thread:$0]  %s3028_s7, 2048, %s98_s13, [#allocation12], %s2879_s8, %s2879_s8, %s2880_s27  }
  0x57   :  { %s2883_s17 = smov [#allocation16]  }
  0x58   :  { %s121_s18 = sshll.u32 %s2883_s17, 4  ;;  %s122_s18 = int_to_ptr.vmem [resolvable:$true] %s121_s18 }
  0x59   :  { %s2827_s19 = scalar_lea.vmem %s122_s18, 4096  ;;  %p2832_p13 = scmp.lt.s32.totalorder %s122_s18, %s122_s18 }
  0x5a   :  { %p2828_p12 = scmp.ne.s32.totalorder %s122_s18, %s2827_s19  ;;  %p2833_p0 = scmp.lt.s32.totalorder %s2827_s19, %s2827_s19 }
  0x5c   :  { %p2834_p1 = por %p2833_p0, %p2832_p13 }
  0x5e   :  { %p2835_p2 = pnand %p2834_p1, %p2828_p12 }
  0x60   :  { %2838 = shalt.err (!%p2835_p2)
}
  0x61   :  { %127 = dma.hbm_to_vmem [thread:$0]  %s3030_s9, 4096, %s122_s18, [#allocation15], %s2873_s25, %s2873_s25, %s2874_s26  }
  0x62   :  { %2859 = dma.done.wait [#allocation3], 256  }
  0x63   :  { %2860 = vsyncadd [#allocation3], 4294967040 }
  0x64   :  { %2861 = dma.done.wait [#allocation6], 2816  }
  0x65   :  { %2862 = vsyncadd [#allocation6], 4294964480 }
  0x66   :  { %2863 = dma.done.wait [#allocation9], 6144  }
  0x67   :  { %2864 = vsyncadd [#allocation9], 4294961152 }
  0x68   :  { %2865 = dma.done.wait [#allocation12], 14336  }
  0x69   :  { %2866 = vsyncadd [#allocation12], 4294952960 }
  0x6a   :  { %2867 = dma.done.wait [#allocation15], 6144  }
  0x6b   :  { %2868 = vsyncadd [#allocation15], 4294961152  ;;  %v2321_v0 = vld [vmem:[#allocation7 + $0x78] sm:$0xff]   ;;  %v2323_v2 = vld [vmem:[#allocation7 + $0x70] sm:$0xff]   ;;  %v2884_v36 = vmov 0   ;;  %s2885_s26 = smov [#allocation17]  }
  0x6c   :  { %v2322_v1 = vld [vmem:[#allocation7 + $0x38] sm:$0xff]   ;;  %2262 = vmatprep.subr.bf16.mxu1 %v2321_v0  ;;  %v2324_v3 = vld [vmem:[#allocation7 + $0x30] sm:$0xff]   ;;  %v2325_v4 = vld [vmem:[#allocation7 + $0x68] sm:$0xff]   ;;  %s2021_s21 = sshll.u32 %s2885_s26, 4  ;;  %s2022_s21 = int_to_ptr.vmem [resolvable:$true] %s2021_s21 }
  0x6d   :  { %2263 = vmatpush3.bf16.msra.mxu1 %v2322_v1  ;;  %v2326_v5 = vld [vmem:[#allocation7 + $0x28] sm:$0xff]   ;;  %v2327_v6 = vld [vmem:[#allocation7 + $0x60] sm:$0xff]   ;;  %v2329_v8 = vld [vmem:[#allocation7 + $0x58] sm:$0xff]   ;;  %s2839_s5 = scalar_lea.vmem %s2022_s21, 256  ;;  %p2844_p4 = scmp.lt.s32.totalorder %s2022_s21, %s2022_s21 }
  0x6e   :  { %2264 = vmatprep.subr.bf16.mxu1 %v2323_v2  ;;  %v2328_v7 = vld [vmem:[#allocation7 + $0x20] sm:$0xff]   ;;  %v2330_v9 = vld [vmem:[#allocation7 + $0x18] sm:$0xff]   ;;  %v2331_v10 = vld [vmem:[#allocation7 + $0x50] sm:$0xff]   ;;  %p2840_p3 = scmp.ne.s32.totalorder %s2022_s21, %s2839_s5  ;;  %p2845_p5 = scmp.lt.s32.totalorder %s2839_s5, %s2839_s5 }
  0x6f   :  { %v159_v11 = vld [vmem:[#allocation2 + $0x8] sm:$0xff]  ;;  %v2332_v13 = vld [vmem:[#allocation7 + $0x10] sm:$0xff]   ;;  %v2335_v16 = vld [vmem:[#allocation7 + $0x40] sm:$0xff]  }
  0x70   :  { %v161_v12 = vpack.c.bf16 %v159_v11, %v159_v11  ;;  %v2333_v14 = vld [vmem:[#allocation7 + $0x48] sm:$0xff]   ;;  %v2336_v17 = vld [vmem:[#allocation7] sm:$0xff]   ;;  %v2339_v19 = vld [vmem:[#allocation8 + $0x74] ss:$8 sps:$4 sm:$0xff]   ;;  %p2846_p6 = por %p2845_p5, %p2844_p4 }
  0x71   :  { %2265 = vmatpush3.bf16.msra.mxu1 %v2324_v3  ;;  %v2334_v15 = vld [vmem:[#allocation7 + $0x8] sm:$0xff]   ;;  %v158_v18 = vld [vmem:[#allocation2] sm:$0xff]  ;;  %v2337_v20 = vld [vmem:[#allocation8 + $0x70] ss:$8 sps:$4 sm:$0xff]  }
  0x72   :  { %2266 = vmatprep.subr.bf16.mxu1 %v2325_v4  ;;  %322 = vmatprep.mubr.bf16.mxu1 %v161_v12  ;;  %v160_v21 = vpack.c.bf16 %v158_v18, %v158_v18  ;;  %v2342_v22 = vld [vmem:[#allocation8 + $0x64] ss:$8 sps:$4 sm:$0xff]   ;;  %v2340_v23 = vld [vmem:[#allocation8 + $0x60] ss:$8 sps:$4 sm:$0xff]   ;;  %v2345_v24 = vld [vmem:[#allocation8 + $0x54] ss:$8 sps:$4 sm:$0xff]   ;;  %p2847_p7 = pnand %p2846_p6, %p2840_p3 }
  0x73   :  { %v2343_v25 = vld [vmem:[#allocation8 + $0x50] ss:$8 sps:$4 sm:$0xff]   ;;  %v2348_v26 = vld [vmem:[#allocation8 + $0x44] ss:$8 sps:$4 sm:$0xff]   ;;  %v2346_v27 = vld [vmem:[#allocation8 + $0x40] ss:$8 sps:$4 sm:$0xff]  }
  0x74   :  { %v2351_v28 = vld [vmem:[#allocation8 + $0x34] ss:$8 sps:$4 sm:$0xff]   ;;  %v2349_v29 = vld [vmem:[#allocation8 + $0x30] ss:$8 sps:$4 sm:$0xff]   ;;  %v2354_v30 = vld [vmem:[#allocation8 + $0x24] ss:$8 sps:$4 sm:$0xff]  }
  0x75   :  { %2267 = vmatpush3.bf16.msra.mxu1 %v2326_v5  ;;  %v2352_v31 = vld [vmem:[#allocation8 + $0x20] ss:$8 sps:$4 sm:$0xff]   ;;  %v2357_v32 = vld [vmem:[#allocation8 + $0x14] ss:$8 sps:$4 sm:$0xff]   ;;  %v2355_v33 = vld [vmem:[#allocation8 + $0x10] ss:$8 sps:$4 sm:$0xff]  }
  0x76   :  { %2268 = vmatprep.subr.bf16.mxu1 %v2327_v6  ;;  %v2360_v34 = vld [vmem:[#allocation8 + $0x4] ss:$8 sps:$4 sm:$0xff]   ;;  %v2358_v35 = vld [vmem:[#allocation8] ss:$8 sps:$4 sm:$0xff]   ;;  %v2361_v37 = vld [vmem:[#allocation11 + $0x74] ss:$8 sps:$4 sm:$0xff]  }
  0x77   :  { %v2363_v38 = vld [vmem:[#allocation11 + $0x70] ss:$8 sps:$4 sm:$0xff]   ;;  %v2364_v39 = vld [vmem:[#allocation11 + $0x64] ss:$8 sps:$4 sm:$0xff]   ;;  %1105 = vmatprep.subr.bf16.mxu0 %v2361_v37  ;;  %v2366_v40 = vld [vmem:[#allocation11 + $0x60] ss:$8 sps:$4 sm:$0xff]  }
  0x78   :  { %1106 = vmatpush1.bf16.msra.mxu0 %v2363_v38  ;;  %v2367_v41 = vld [vmem:[#allocation11 + $0x54] ss:$8 sps:$4 sm:$0xff]   ;;  %v2369_v42 = vld [vmem:[#allocation11 + $0x50] ss:$8 sps:$4 sm:$0xff]   ;;  %v2370_v43 = vld [vmem:[#allocation11 + $0x44] ss:$8 sps:$4 sm:$0xff]  }
  0x79   :  { %2269 = vmatpush3.bf16.msra.mxu1 %v2328_v7  ;;  %1107 = vmatprep.subr.bf16.mxu0 %v2364_v39  ;;  %v2410_v44 = vld [vmem:[#allocation11 + $0x174] ss:$8 sps:$4 sm:$0xff]   ;;  %v2372_v45 = vld [vmem:[#allocation11 + $0x40] ss:$8 sps:$4 sm:$0xff]   ;;  %v2375_v49 = vld [vmem:[#allocation11 + $0x30] ss:$8 sps:$4 sm:$0xff]  }
  0x7a   :  { %2270 = vmatprep.subr.bf16.mxu1 %v2329_v8  ;;  %v484_v46 = vld [vmem:[#allocation5 + $0x8] sm:$0xff]  ;;  %v2376_v50 = vld [vmem:[#allocation11 + $0x24] ss:$8 sps:$4 sm:$0xff]   ;;  %v2378_v51 = vld [vmem:[#allocation11 + $0x20] ss:$8 sps:$4 sm:$0xff]  }
  0x7b   :  { %v2373_v47 = vld [vmem:[#allocation11 + $0x34] ss:$8 sps:$4 sm:$0xff]   ;;  %v524_v48 = vpack.c.bf16 %v484_v46, %v484_v46  ;;  %v2381_v53 = vld [vmem:[#allocation11 + $0x10] ss:$8 sps:$4 sm:$0xff]   ;;  %v2382_v54 = vld [vmem:[#allocation11 + $0x4] ss:$8 sps:$4 sm:$0xff]  }
  0x7c   :  { %1108 = vmatpush1.bf16.msra.mxu0 %v2366_v40  ;;  %v2379_v52 = vld [vmem:[#allocation11 + $0x14] ss:$8 sps:$4 sm:$0xff]   ;;  %v2384_v55 = vld [vmem:[#allocation11] ss:$8 sps:$4 sm:$0xff]   ;;  %v2387_v57 = vld [vmem:[#allocation11 + $0xf0] ss:$8 sps:$4 sm:$0xff]  }
  0x7d   :  { %2271 = vmatpush3.bf16.msra.mxu1 %v2330_v9  ;;  %1109 = vmatprep.subr.bf16.mxu0 %v2367_v41  ;;  %v2385_v56 = vld [vmem:[#allocation11 + $0xf4] ss:$8 sps:$4 sm:$0xff]   ;;  %v2388_v58 = vld [vmem:[#allocation11 + $0xe4] ss:$8 sps:$4 sm:$0xff]   ;;  %v2390_v59 = vld [vmem:[#allocation11 + $0xe0] ss:$8 sps:$4 sm:$0xff]  }
  0x7e   :  { %2272 = vmatprep.subr.bf16.mxu1 %v2331_v10  ;;  %1137 = vmatprep.mubr.bf16.mxu0 %v524_v48  ;;  %v2391_v60 = vld [vmem:[#allocation11 + $0xd4] ss:$8 sps:$4 sm:$0xff]   ;;  %v2393_v61 = vld [vmem:[#allocation11 + $0xd0] ss:$8 sps:$4 sm:$0xff]   ;;  %v2394_v62 = vld [vmem:[#allocation11 + $0xc4] ss:$8 sps:$4 sm:$0xff]  }
  0x7f   :  { %v2396_v63 = vld [vmem:[#allocation11 + $0xc0] ss:$8 sps:$4 sm:$0xff]   ;;  %v2397_v0 = vld [vmem:[#allocation11 + $0xb4] ss:$8 sps:$4 sm:$0xff]   ;;  %v2399_v1 = vld [vmem:[#allocation11 + $0xb0] ss:$8 sps:$4 sm:$0xff]  }
  0x80   :  { %1110 = vmatpush1.bf16.msra.mxu0 %v2369_v42  ;;  %v2400_v2 = vld [vmem:[#allocation11 + $0xa4] ss:$8 sps:$4 sm:$0xff]   ;;  %v2402_v3 = vld [vmem:[#allocation11 + $0xa0] ss:$8 sps:$4 sm:$0xff]   ;;  %v2403_v4 = vld [vmem:[#allocation11 + $0x94] ss:$8 sps:$4 sm:$0xff]  }
  0x81   :  { %2273 = vmatpush3.bf16.msra.mxu1 %v2332_v13  ;;  %1111 = vmatprep.subr.bf16.mxu0 %v2370_v43  ;;  %v2405_v5 = vld [vmem:[#allocation11 + $0x90] ss:$8 sps:$4 sm:$0xff]   ;;  %v2406_v6 = vld [vmem:[#allocation11 + $0x84] ss:$8 sps:$4 sm:$0xff]   ;;  %v2411_v7 = vld [vmem:[#allocation11 + $0x80] ss:$8 sps:$4 sm:$0xff]  }
  0x82   :  { %2274 = vmatprep.subr.bf16.mxu1 %v2333_v14  ;;  %v483_v8 = vld [vmem:[#allocation5] sm:$0xff]  ;;  %v2423_v12 = vld [vmem:[#allocation11 + $0x264] ss:$8 sps:$4 sm:$0xff]   ;;  %v488_v13 = vld [vmem:[#allocation5 + $0x28] sm:$0xff] }
  0x83   :  { %v2417_v9 = vld [vmem:[#allocation11 + $0x274] ss:$8 sps:$4 sm:$0xff]   ;;  %v523_v10 = vpack.c.bf16 %v483_v8, %v483_v8  ;;  %v2415_v11 = vld [vmem:[#allocation11 + $0x270] ss:$8 sps:$4 sm:$0xff]   ;;  %v528_v14 = vpack.c.bf16 %v488_v13, %v488_v13  ;;  %v2435_v18 = vld [vmem:[#allocation11 + $0x244] ss:$8 sps:$4 sm:$0xff]  }
  0x84   :  { %1112 = vmatpush1.bf16.msra.mxu0 %v2372_v45  ;;  %v2489_v37 = vld [vmem:[#allocation11 + $0x2b4] ss:$8 sps:$4 sm:$0xff]   ;;  %v2487_v38 = vld [vmem:[#allocation11 + $0x2b0] ss:$8 sps:$4 sm:$0xff]   ;;  %v2495_v39 = vld [vmem:[#allocation11 + $0x2a4] ss:$8 sps:$4 sm:$0xff]  }
  0x85   :  { %2275 = vmatpush3.bf16.msra.mxu1 %v2334_v15  ;;  %1113 = vmatprep.subr.bf16.mxu0 %v2373_v47  ;;  %v2421_v15 = vld [vmem:[#allocation11 + $0x260] ss:$8 sps:$4 sm:$0xff]   ;;  %v2501_v41 = vld [vmem:[#allocation11 + $0x294] ss:$8 sps:$4 sm:$0xff]   ;;  %v2499_v43 = vld [vmem:[#allocation11 + $0x290] ss:$8 sps:$4 sm:$0xff]  }
  0x86   :  { %2276 = vmatprep.subr.bf16.mxu1 %v2335_v16  ;;  %v2429_v16 = vld [vmem:[#allocation11 + $0x254] ss:$8 sps:$4 sm:$0xff]   ;;  %v2493_v40 = vld [vmem:[#allocation11 + $0x2a0] ss:$8 sps:$4 sm:$0xff]   ;;  %v2454_v8 = vld [vmem:[#allocation11 + $0x1f0] ss:$8 sps:$4 sm:$0xff]  }
  0x87   :  { %v486_v47 = vld [vmem:[#allocation5 + $0x18] sm:$0xff] }
  0x88   :  { %1114 = vmatpush1.bf16.msra.mxu0 %v2375_v49  ;;  %v2502_v49 = vld [vmem:[#allocation11 + $0x280] ss:$8 sps:$4 sm:$0xff]   ;;  %v2474_v13 = vld [vmem:[#allocation11 + $0x1c4] ss:$8 sps:$4 sm:$0xff]  }
  0x89   :  { %2277 = vmatpush3.bf16.msra.mxu1 %v2336_v17  ;;  %1115 = vmatprep.subr.bf16.mxu0 %v2376_v50  ;;  %v2427_v17 = vld [vmem:[#allocation11 + $0x250] ss:$8 sps:$4 sm:$0xff]  }
  0x8a   :  { %428 = vmatprep.subr.bf16.mxu1 %v2339_v19  ;;  %v2433_v19 = vld [vmem:[#allocation11 + $0x240] ss:$8 sps:$4 sm:$0xff]   ;;  %v487_v50 = vld [vmem:[#allocation5 + $0x20] sm:$0xff] }
  0x8c   :  { %323 = vmatmul.mubr.bf16.vlgmr.msra.gmra.mxu1 %v160_v21  ;;  %1116 = vmatpush1.bf16.msra.mxu0 %v2378_v51  ;;  %v2439_v21 = vld [vmem:[#allocation11 + $0x230] ss:$8 sps:$4 sm:$0xff]  }
  0x8d   :  { %429 = vmatpush1.bf16.msra.mxu1 %v2337_v20  ;;  %460 = vmatprep.mubr.bf16.mxu1 %v2884_v36  ;;  %v2441_v20 = vld [vmem:[#allocation11 + $0x234] ss:$8 sps:$4 sm:$0xff]  }
  0x8e   :  { %430 = vmatprep.subr.bf16.mxu1 %v2342_v22  ;;  %1117 = vmatprep.subr.bf16.mxu0 %v2379_v52  ;;  %v2447_v22 = vld [vmem:[#allocation11 + $0x224] ss:$8 sps:$4 sm:$0xff]  }
  0x90   :  { %1118 = vmatpush1.bf16.msra.mxu0 %v2381_v53  ;;  %v2408_v53 = vld [vmem:[#allocation11 + $0x170] ss:$8 sps:$4 sm:$0xff]  }
  0x91   :  { %431 = vmatpush1.bf16.msra.mxu1 %v2340_v23  ;;  %1119 = vmatprep.subr.bf16.mxu0 %v2382_v54  ;;  %v2445_v23 = vld [vmem:[#allocation11 + $0x220] ss:$8 sps:$4 sm:$0xff]   ;;  %v526_v54 = vpack.c.bf16 %v486_v47, %v486_v47  ;;  %v2535_v47 = vld [vmem:[#allocation10 + $0xd0] ss:$8 sps:$4 sm:$0xff]  }
  0x92   :  { %432 = vmatprep.subr.bf16.mxu1 %v2345_v24  ;;  %v2453_v24 = vld [vmem:[#allocation11 + $0x214] ss:$8 sps:$4 sm:$0xff]  }
  0x94   :  { %1120 = vmatpush1.bf16.msra.mxu0 %v2384_v55 }
  0x95   :  { %433 = vmatpush1.bf16.msra.mxu1 %v2343_v25  ;;  %1121 = vmatprep.subr.bf16.mxu0 %v2385_v56  ;;  %v2451_v25 = vld [vmem:[#allocation11 + $0x210] ss:$8 sps:$4 sm:$0xff]   ;;  %v2414_v56 = vld [vmem:[#allocation11 + $0x164] ss:$8 sps:$4 sm:$0xff]  }
  0x96   :  { %434 = vmatprep.subr.bf16.mxu1 %v2348_v26  ;;  %v2459_v26 = vld [vmem:[#allocation11 + $0x204] ss:$8 sps:$4 sm:$0xff]  }
  0x98   :  { %1122 = vmatpush2.bf16.msra.mxu0 %v2387_v57  ;;  %v527_v57 = vpack.c.bf16 %v487_v50, %v487_v50  ;;  %v2543_v50 = vld [vmem:[#allocation10 + $0xb4] ss:$8 sps:$4 sm:$0xff]  }
  0x99   :  { %435 = vmatpush1.bf16.msra.mxu1 %v2346_v27  ;;  %1123 = vmatprep.subr.bf16.mxu0 %v2388_v58  ;;  %v2457_v27 = vld [vmem:[#allocation11 + $0x200] ss:$8 sps:$4 sm:$0xff]  }
  0x9a   :  { %436 = vmatprep.subr.bf16.mxu1 %v2351_v28  ;;  %v2465_v28 = vld [vmem:[#allocation11 + $0x2f4] ss:$8 sps:$4 sm:$0xff]   ;;  %v2412_v58 = vld [vmem:[#allocation11 + $0x160] ss:$8 sps:$4 sm:$0xff]  }
  0x9c   :  { %1124 = vmatpush2.bf16.msra.mxu0 %v2390_v59  ;;  %v2420_v59 = vld [vmem:[#allocation11 + $0x154] ss:$8 sps:$4 sm:$0xff]  }
  0x9d   :  { %437 = vmatpush1.bf16.msra.mxu1 %v2349_v29  ;;  %1125 = vmatprep.subr.bf16.mxu0 %v2391_v60  ;;  %v2463_v29 = vld [vmem:[#allocation11 + $0x2f0] ss:$8 sps:$4 sm:$0xff]  }
  0x9e   :  { %438 = vmatprep.subr.bf16.mxu1 %v2354_v30  ;;  %v2471_v30 = vld [vmem:[#allocation11 + $0x2e4] ss:$8 sps:$4 sm:$0xff]   ;;  %v2418_v60 = vld [vmem:[#allocation11 + $0x150] ss:$8 sps:$4 sm:$0xff]  }
  0xa0   :  { %1126 = vmatpush2.bf16.msra.mxu0 %v2393_v61  ;;  %v2426_v61 = vld [vmem:[#allocation11 + $0x144] ss:$8 sps:$4 sm:$0xff]  }
  0xa1   :  { %439 = vmatpush1.bf16.msra.mxu1 %v2352_v31  ;;  %1127 = vmatprep.subr.bf16.mxu0 %v2394_v62  ;;  %v2469_v31 = vld [vmem:[#allocation11 + $0x2e0] ss:$8 sps:$4 sm:$0xff]  }
  0xa2   :  { %440 = vmatprep.subr.bf16.mxu1 %v2357_v32  ;;  %v2477_v32 = vld [vmem:[#allocation11 + $0x2d4] ss:$8 sps:$4 sm:$0xff]   ;;  %v2424_v62 = vld [vmem:[#allocation11 + $0x140] ss:$8 sps:$4 sm:$0xff]  }
  0xa4   :  { %1128 = vmatpush2.bf16.msra.mxu0 %v2396_v63  ;;  %v2432_v63 = vld [vmem:[#allocation11 + $0x134] ss:$8 sps:$4 sm:$0xff]  }
  0xa5   :  { %441 = vmatpush1.bf16.msra.mxu1 %v2355_v33  ;;  %1129 = vmatprep.subr.bf16.mxu0 %v2397_v0  ;;  %v2475_v33 = vld [vmem:[#allocation11 + $0x2d0] ss:$8 sps:$4 sm:$0xff]  }
  0xa6   :  { %442 = vmatprep.subr.bf16.mxu1 %v2360_v34  ;;  %v2483_v34 = vld [vmem:[#allocation11 + $0x2c4] ss:$8 sps:$4 sm:$0xff]   ;;  %v2430_v0 = vld [vmem:[#allocation11 + $0x130] ss:$8 sps:$4 sm:$0xff]  }
  0xa8   :  { %1130 = vmatpush2.bf16.msra.mxu0 %v2399_v1  ;;  %v2438_v1 = vld [vmem:[#allocation11 + $0x124] ss:$8 sps:$4 sm:$0xff]  }
  0xa9   :  { %443 = vmatpush1.bf16.msra.mxu1 %v2358_v35  ;;  %1131 = vmatprep.subr.bf16.mxu0 %v2400_v2  ;;  %v2481_v35 = vld [vmem:[#allocation11 + $0x2c0] ss:$8 sps:$4 sm:$0xff]  }
  0xaa   :  { %1146 = vmatprep.subr.bf16.mxu1 %v2410_v44  ;;  %v2504_v44 = vld [vmem:[#allocation11 + $0x284] ss:$8 sps:$4 sm:$0xff]   ;;  %v2436_v2 = vld [vmem:[#allocation11 + $0x120] ss:$8 sps:$4 sm:$0xff]  }
  0xac   :  { %1132 = vmatpush2.bf16.msra.mxu0 %v2402_v3  ;;  %v2444_v3 = vld [vmem:[#allocation11 + $0x114] ss:$8 sps:$4 sm:$0xff]  }
  0xad   :  { %1133 = vmatprep.subr.bf16.mxu0 %v2403_v4  ;;  %v2442_v4 = vld [vmem:[#allocation11 + $0x110] ss:$8 sps:$4 sm:$0xff]  }
  0xb0   :  { %1134 = vmatpush2.bf16.msra.mxu0 %v2405_v5  ;;  %v2450_v5 = vld [vmem:[#allocation11 + $0x104] ss:$8 sps:$4 sm:$0xff]  }
  0xb1   :  { %1135 = vmatprep.subr.bf16.mxu0 %v2406_v6  ;;  %v2448_v6 = vld [vmem:[#allocation11 + $0x100] ss:$8 sps:$4 sm:$0xff]  }
  0xb4   :  { %1136 = vmatpush2.bf16.msra.mxu0 %v2411_v7  ;;  %v2456_v7 = vld [vmem:[#allocation11 + $0x1f4] ss:$8 sps:$4 sm:$0xff]  }
  0xb5   :  { %1187 = vmatprep.subr.bf16.mxu0 %v2417_v9  ;;  %v2462_v9 = vld [vmem:[#allocation11 + $0x1e4] ss:$8 sps:$4 sm:$0xff]  }
  0xb7   :  { %1138 = vmatmul.mubr.bf16.vlgmr.msra.gmra.mxu0 %v523_v10  ;;  %v2460_v10 = vld [vmem:[#allocation11 + $0x1e0] ss:$8 sps:$4 sm:$0xff]  }
  0xb8   :  { %1188 = vmatpush1.bf16.msra.mxu0 %v2415_v11  ;;  %1219 = vmatprep.mubr.bf16.mxu0 %v528_v14  ;;  %v2468_v11 = vld [vmem:[#allocation11 + $0x1d4] ss:$8 sps:$4 sm:$0xff]   ;;  %v2472_v14 = vld [vmem:[#allocation11 + $0x1c0] ss:$8 sps:$4 sm:$0xff]  }
  0xb9   :  { %1189 = vmatprep.subr.bf16.mxu0 %v2423_v12  ;;  %v2466_v12 = vld [vmem:[#allocation11 + $0x1d0] ss:$8 sps:$4 sm:$0xff]  }
  0xbc   :  { %1190 = vmatpush1.bf16.msra.mxu0 %v2421_v15  ;;  %v2480_v15 = vld [vmem:[#allocation11 + $0x1b4] ss:$8 sps:$4 sm:$0xff]  }
  0xbd   :  { %1191 = vmatprep.subr.bf16.mxu0 %v2429_v16  ;;  %v2478_v16 = vld [vmem:[#allocation11 + $0x1b0] ss:$8 sps:$4 sm:$0xff]  }
  0xc0   :  { %1192 = vmatpush1.bf16.msra.mxu0 %v2427_v17  ;;  %v2486_v17 = vld [vmem:[#allocation11 + $0x1a4] ss:$8 sps:$4 sm:$0xff]  }
  0xc1   :  { %1193 = vmatprep.subr.bf16.mxu0 %v2435_v18  ;;  %v2484_v18 = vld [vmem:[#allocation11 + $0x1a0] ss:$8 sps:$4 sm:$0xff]  }
  0xc4   :  { %1194 = vmatpush1.bf16.msra.mxu0 %v2433_v19  ;;  %v2492_v19 = vld [vmem:[#allocation11 + $0x194] ss:$8 sps:$4 sm:$0xff]  }
  0xc5   :  { %1195 = vmatprep.subr.bf16.mxu0 %v2441_v20  ;;  %v2490_v20 = vld [vmem:[#allocation11 + $0x190] ss:$8 sps:$4 sm:$0xff]  }
  0xc8   :  { %1196 = vmatpush1.bf16.msra.mxu0 %v2439_v21  ;;  %v2498_v21 = vld [vmem:[#allocation11 + $0x184] ss:$8 sps:$4 sm:$0xff]  }
  0xc9   :  { %1197 = vmatprep.subr.bf16.mxu0 %v2447_v22  ;;  %v2496_v22 = vld [vmem:[#allocation11 + $0x180] ss:$8 sps:$4 sm:$0xff]  }
  0xcc   :  { %1198 = vmatpush1.bf16.msra.mxu0 %v2445_v23  ;;  %v485_v23 = vld [vmem:[#allocation5 + $0x10] sm:$0xff] }
  0xcd   :  { %1199 = vmatprep.subr.bf16.mxu0 %v2453_v24  ;;  %v2507_v24 = vld [vmem:[#allocation10 + $0x74] ss:$8 sps:$4 sm:$0xff]  }
  0xd0   :  { %1200 = vmatpush1.bf16.msra.mxu0 %v2451_v25  ;;  %v525_v25 = vpack.c.bf16 %v485_v23, %v485_v23 }
  0xd1   :  { %1201 = vmatprep.subr.bf16.mxu0 %v2459_v26  ;;  %v2505_v26 = vld [vmem:[#allocation10 + $0x70] ss:$8 sps:$4 sm:$0xff]  }
  0xd4   :  { %1202 = vmatpush1.bf16.msra.mxu0 %v2457_v27  ;;  %v2510_v27 = vld [vmem:[#allocation10 + $0x64] ss:$8 sps:$4 sm:$0xff]  }
  0xd5   :  { %1203 = vmatprep.subr.bf16.mxu0 %v2465_v28  ;;  %v2508_v28 = vld [vmem:[#allocation10 + $0x60] ss:$8 sps:$4 sm:$0xff]  }
  0xd8   :  { %1204 = vmatpush2.bf16.msra.mxu0 %v2463_v29  ;;  %v2513_v29 = vld [vmem:[#allocation10 + $0x54] ss:$8 sps:$4 sm:$0xff]  }
  0xd9   :  { %1205 = vmatprep.subr.bf16.mxu0 %v2471_v30  ;;  %v2511_v30 = vld [vmem:[#allocation10 + $0x50] ss:$8 sps:$4 sm:$0xff]  }
  0xdc   :  { %1206 = vmatpush2.bf16.msra.mxu0 %v2469_v31  ;;  %v2516_v31 = vld [vmem:[#allocation10 + $0x44] ss:$8 sps:$4 sm:$0xff]  }
  0xdd   :  { %1207 = vmatprep.subr.bf16.mxu0 %v2477_v32  ;;  %v2514_v32 = vld [vmem:[#allocation10 + $0x40] ss:$8 sps:$4 sm:$0xff]  }
  0xe0   :  { %1208 = vmatpush2.bf16.msra.mxu0 %v2475_v33  ;;  %v2519_v33 = vld [vmem:[#allocation10 + $0x34] ss:$8 sps:$4 sm:$0xff]  }
  0xe1   :  { %1209 = vmatprep.subr.bf16.mxu0 %v2483_v34  ;;  %v2517_v34 = vld [vmem:[#allocation10 + $0x30] ss:$8 sps:$4 sm:$0xff]  }
  0xe4   :  { %1210 = vmatpush2.bf16.msra.mxu0 %v2481_v35  ;;  %v2522_v35 = vld [vmem:[#allocation10 + $0x24] ss:$8 sps:$4 sm:$0xff]  }
  0xe5   :  { %1211 = vmatprep.subr.bf16.mxu0 %v2489_v37  ;;  %v2520_v37 = vld [vmem:[#allocation10 + $0x20] ss:$8 sps:$4 sm:$0xff]  }
  0xe8   :  { %1212 = vmatpush2.bf16.msra.mxu0 %v2487_v38  ;;  %v2525_v38 = vld [vmem:[#allocation10 + $0x14] ss:$8 sps:$4 sm:$0xff]  }
  0xe9   :  { %1213 = vmatprep.subr.bf16.mxu0 %v2495_v39  ;;  %v2523_v39 = vld [vmem:[#allocation10 + $0x10] ss:$8 sps:$4 sm:$0xff]  }
  0xec   :  { %1214 = vmatpush2.bf16.msra.mxu0 %v2493_v40  ;;  %v2528_v40 = vld [vmem:[#allocation10 + $0x4] ss:$8 sps:$4 sm:$0xff]  }
  0xed   :  { %1215 = vmatprep.subr.bf16.mxu0 %v2501_v41  ;;  %v2526_v41 = vld [vmem:[#allocation10] ss:$8 sps:$4 sm:$0xff]  }
  0xf0   :  { %1216 = vmatpush2.bf16.msra.mxu0 %v2499_v43  ;;  %v2529_v43 = vld [vmem:[#allocation10 + $0xf0] ss:$8 sps:$4 sm:$0xff]  }
  0xf1   :  { %1217 = vmatprep.subr.bf16.mxu0 %v2504_v44  ;;  %v2534_v44 = vld [vmem:[#allocation10 + $0xe4] ss:$8 sps:$4 sm:$0xff]  }
  0xf4   :  { %1218 = vmatpush2.bf16.msra.mxu0 %v2502_v49  ;;  %v2538_v49 = vld [vmem:[#allocation10 + $0xc0] ss:$8 sps:$4 sm:$0xff]  }
  0xf7   :  { %1220 = vmatmul.mubr.bf16.vlgmr.msra.gmra.mxu0 %v527_v57  ;;  %v2550_v57 = vld [vmem:[#allocation10 + $0x80] ss:$8 sps:$4 sm:$0xff]  }
 0x14c   :  { %v2278_v42 = vpop.f32.mrf.mxu1 }
 0x14e   :  { %v2279_v45 = vpop.f32.mrf.mxu1 }
 0x14f   :  { %v2280_v46 = vadd.f32 %v2279_v45, %v2278_v42  ;;  %v2531_v42 = vld [vmem:[#allocation10 + $0xf4] ss:$8 sps:$4 sm:$0xff]   ;;  %v2532_v45 = vld [vmem:[#allocation10 + $0xe0] ss:$8 sps:$4 sm:$0xff]  }
 0x150   :  { %v2281_v48 = vpop.f32.mrf.mxu1 }
 0x151   :  { %v330_v51 = vmax.f32 %v2280_v46, 0.0  ;;  %v2537_v46 = vld [vmem:[#allocation10 + $0xd4] ss:$8 sps:$4 sm:$0xff]   ;;  %v2540_v48 = vld [vmem:[#allocation10 + $0xc4] ss:$8 sps:$4 sm:$0xff]  }
 0x152   :  { %v2282_v52 = vpop.f32.mrf.mxu1 }
 0x153   :  { %v331_v55 = vpack.c.bf16 %v330_v51, %v330_v51  ;;  %v2541_v51 = vld [vmem:[#allocation10 + $0xb0] ss:$8 sps:$4 sm:$0xff]   ;;  %v2546_v52 = vld [vmem:[#allocation10 + $0xa4] ss:$8 sps:$4 sm:$0xff]  }
 0x155   :  { %461 = vmatmul.mubr.bf16.vlgmr.msra.gmra.mxu1 %v331_v55  ;;  %v2547_v55 = vld [vmem:[#allocation10 + $0x90] ss:$8 sps:$4 sm:$0xff]  }
 0x156   :  { %1147 = vmatpush1.bf16.msra.mxu1 %v2408_v53  ;;  %1178 = vmatprep.mubr.bf16.mxu1 %v526_v54  ;;  %v2544_v53 = vld [vmem:[#allocation10 + $0xa0] ss:$8 sps:$4 sm:$0xff]   ;;  %v2549_v54 = vld [vmem:[#allocation10 + $0x94] ss:$8 sps:$4 sm:$0xff]  }
 0x157   :  { %1148 = vmatprep.subr.bf16.mxu1 %v2414_v56  ;;  %v2552_v56 = vld [vmem:[#allocation10 + $0x84] ss:$8 sps:$4 sm:$0xff]  }
 0x15a   :  { %1149 = vmatpush1.bf16.msra.mxu1 %v2412_v58 }
 0x15b   :  { %1150 = vmatprep.subr.bf16.mxu1 %v2420_v59 }
 0x15e   :  { %1151 = vmatpush1.bf16.msra.mxu1 %v2418_v60 }
 0x15f   :  { %1152 = vmatprep.subr.bf16.mxu1 %v2426_v61  ;;  %v2553_v61 = vld [vmem:[#allocation13 + $0x78] sm:$0xff]  }
 0x160   :  { %2284 = vmatprep.subr.bf16.mxu0 %v2553_v61 }
 0x162   :  { %1153 = vmatpush1.bf16.msra.mxu1 %v2424_v62  ;;  %v2554_v62 = vld [vmem:[#allocation13 + $0x38] sm:$0xff]  }
 0x163   :  { %1154 = vmatprep.subr.bf16.mxu1 %v2432_v63  ;;  %v2555_v63 = vld [vmem:[#allocation13 + $0x70] sm:$0xff]   ;;  %2285 = vmatpush3.bf16.msra.mxu0 %v2554_v62 }
 0x164   :  { %2286 = vmatprep.subr.bf16.mxu0 %v2555_v63 }
 0x166   :  { %1155 = vmatpush1.bf16.msra.mxu1 %v2430_v0 }
 0x167   :  { %1156 = vmatprep.subr.bf16.mxu1 %v2438_v1  ;;  %v2556_v1 = vld [vmem:[#allocation13 + $0x30] sm:$0xff]  }
 0x168   :  { %2287 = vmatpush3.bf16.msra.mxu0 %v2556_v1 }
 0x16a   :  { %1157 = vmatpush1.bf16.msra.mxu1 %v2436_v2  ;;  %v2557_v2 = vld [vmem:[#allocation13 + $0x68] sm:$0xff]  }
 0x16b   :  { %1158 = vmatprep.subr.bf16.mxu1 %v2444_v3  ;;  %v2558_v3 = vld [vmem:[#allocation13 + $0x28] sm:$0xff]   ;;  %2288 = vmatprep.subr.bf16.mxu0 %v2557_v2 }
 0x16c   :  { %2289 = vmatpush3.bf16.msra.mxu0 %v2558_v3 }
 0x16e   :  { %1159 = vmatpush1.bf16.msra.mxu1 %v2442_v4  ;;  %v2559_v4 = vld [vmem:[#allocation13 + $0x60] sm:$0xff]  }
 0x16f   :  { %1160 = vmatprep.subr.bf16.mxu1 %v2450_v5  ;;  %v2560_v5 = vld [vmem:[#allocation13 + $0x20] sm:$0xff]   ;;  %2290 = vmatprep.subr.bf16.mxu0 %v2559_v4 }
 0x170   :  { %2291 = vmatpush3.bf16.msra.mxu0 %v2560_v5 }
 0x172   :  { %1161 = vmatpush1.bf16.msra.mxu1 %v2448_v6  ;;  %v2561_v6 = vld [vmem:[#allocation13 + $0x58] sm:$0xff]  }
 0x173   :  { %1162 = vmatprep.subr.bf16.mxu1 %v2456_v7  ;;  %v2562_v7 = vld [vmem:[#allocation13 + $0x18] sm:$0xff]   ;;  %2292 = vmatprep.subr.bf16.mxu0 %v2561_v6 }
 0x174   :  { %2293 = vmatpush3.bf16.msra.mxu0 %v2562_v7 }
 0x176   :  { %1163 = vmatpush2.bf16.msra.mxu1 %v2454_v8  ;;  %v2563_v8 = vld [vmem:[#allocation13 + $0x50] sm:$0xff]  }
 0x177   :  { %1164 = vmatprep.subr.bf16.mxu1 %v2462_v9  ;;  %v1139_v58 = vpop.f32.mrf.mxu0  ;;  %v2564_v9 = vld [vmem:[#allocation13 + $0x10] sm:$0xff]   ;;  %2294 = vmatprep.subr.bf16.mxu0 %v2563_v8 }
 0x178   :  { %2295 = vmatpush3.bf16.msra.mxu0 %v2564_v9  ;;  %v2589_v9 = vld [vmem:[#allocation14 + $0x14] ss:$8 sps:$4 sm:$0xff]  }
 0x179   :  { %v1141_v59 = vpop.f32.mrf.mxu0 }
 0x17a   :  { %1165 = vmatpush2.bf16.msra.mxu1 %v2460_v10 }
 0x17b   :  { %1166 = vmatprep.subr.bf16.mxu1 %v2468_v11  ;;  %v1143_v60 = vpop.f32.mrf.mxu0 }
 0x17d   :  { %v1144_v0 = vpop.f32.mrf.mxu0 }
 0x17e   :  { %1167 = vmatpush2.bf16.msra.mxu1 %v2466_v12 }
 0x17f   :  { %1168 = vmatprep.subr.bf16.mxu1 %v2474_v13 }
 0x182   :  { %1169 = vmatpush2.bf16.msra.mxu1 %v2472_v14 }
 0x183   :  { %1170 = vmatprep.subr.bf16.mxu1 %v2480_v15 }
 0x186   :  { %1171 = vmatpush2.bf16.msra.mxu1 %v2478_v16 }
 0x187   :  { %1172 = vmatprep.subr.bf16.mxu1 %v2486_v17 }
 0x18a   :  { %1173 = vmatpush2.bf16.msra.mxu1 %v2484_v18 }
 0x18b   :  { %1174 = vmatprep.subr.bf16.mxu1 %v2492_v19 }
 0x18e   :  { %1175 = vmatpush2.bf16.msra.mxu1 %v2490_v20 }
 0x18f   :  { %1176 = vmatprep.subr.bf16.mxu1 %v2498_v21 }
 0x192   :  { %1177 = vmatpush2.bf16.msra.mxu1 %v2496_v22 }
 0x193   :  { %1388 = vmatprep.subr.bf16.mxu1 %v2507_v24 }
 0x195   :  { %1179 = vmatmul.mubr.bf16.vlgmr.msra.gmra.mxu1 %v525_v25 }
 0x196   :  { %1389 = vmatpush1.bf16.msra.mxu1 %v2505_v26  ;;  %v2657_v26 = vld [vmem:[#allocation2] sm:$0xff] }
 0x197   :  { %1390 = vmatprep.subr.bf16.mxu1 %v2510_v27 }
 0x19a   :  { %1391 = vmatpush1.bf16.msra.mxu1 %v2508_v28  ;;  %v2658_v28 = vld [vmem:[#allocation2 + $0x8] sm:$0xff] }
 0x19b   :  { %1392 = vmatprep.subr.bf16.mxu1 %v2513_v29 }
 0x19e   :  { %1393 = vmatpush1.bf16.msra.mxu1 %v2511_v30 }
 0x19f   :  { %1394 = vmatprep.subr.bf16.mxu1 %v2516_v31 }
 0x1a2   :  { %1395 = vmatpush1.bf16.msra.mxu1 %v2514_v32 }
 0x1a3   :  { %1396 = vmatprep.subr.bf16.mxu1 %v2519_v33 }
 0x1a6   :  { %1397 = vmatpush1.bf16.msra.mxu1 %v2517_v34 }
 0x1a7   :  { %1398 = vmatprep.subr.bf16.mxu1 %v2522_v35 }
 0x1aa   :  { %1399 = vmatpush1.bf16.msra.mxu1 %v2520_v37 }
 0x1ab   :  { %1400 = vmatprep.subr.bf16.mxu1 %v2525_v38 }
 0x1ae   :  { %1401 = vmatpush1.bf16.msra.mxu1 %v2523_v39 }
 0x1af   :  { %1402 = vmatprep.subr.bf16.mxu1 %v2528_v40 }
 0x1b2   :  { %1403 = vmatpush1.bf16.msra.mxu1 %v2526_v41  ;;  %v2565_v41 = vld [vmem:[#allocation13 + $0x48] sm:$0xff]  }
 0x1b3   :  { %1404 = vmatprep.subr.bf16.mxu1 %v2531_v42  ;;  %v2566_v42 = vld [vmem:[#allocation13 + $0x8] sm:$0xff]   ;;  %2296 = vmatprep.subr.bf16.mxu0 %v2565_v41  ;;  %v2625_v41 = vld [vmem:[#allocation16 + $0xd4] ss:$8 sps:$4 sm:$0xff]  }
 0x1b4   :  { %2297 = vmatpush3.bf16.msra.mxu0 %v2566_v42  ;;  %v2623_v42 = vld [vmem:[#allocation16 + $0xd0] ss:$8 sps:$4 sm:$0xff]  }
 0x1b6   :  { %1405 = vmatpush2.bf16.msra.mxu1 %v2529_v43  ;;  %v2567_v43 = vld [vmem:[#allocation13 + $0x40] sm:$0xff]  }
 0x1b7   :  { %1406 = vmatprep.subr.bf16.mxu1 %v2534_v44  ;;  %v1221_v13 = vpop.f32.mrf.mxu0  ;;  %v2568_v44 = vld [vmem:[#allocation13] sm:$0xff]   ;;  %2298 = vmatprep.subr.bf16.mxu0 %v2567_v43 }
 0x1b8   :  { %2299 = vmatpush3.bf16.msra.mxu0 %v2568_v44  ;;  %v2628_v43 = vld [vmem:[#allocation16 + $0xc4] ss:$8 sps:$4 sm:$0xff]   ;;  %v2626_v44 = vld [vmem:[#allocation16 + $0xc0] ss:$8 sps:$4 sm:$0xff]  }
 0x1b9   :  { %v1223_v16 = vpop.f32.mrf.mxu0 }
 0x1ba   :  { %1407 = vmatpush2.bf16.msra.mxu1 %v2532_v45  ;;  %v2569_v45 = vld [vmem:[#allocation14 + $0x70] ss:$8 sps:$4 sm:$0xff]  }
 0x1bb   :  { %1408 = vmatprep.subr.bf16.mxu1 %v2537_v46  ;;  %v1225_v18 = vpop.f32.mrf.mxu0  ;;  %v2571_v46 = vld [vmem:[#allocation14 + $0x74] ss:$8 sps:$4 sm:$0xff]  }
 0x1bc   :  { %v2599_v18 = vld [vmem:[#allocation16 + $0x50] ss:$8 sps:$4 sm:$0xff]  }
 0x1bd   :  { %v1226_v19 = vpop.f32.mrf.mxu0 }
 0x1be   :  { %1409 = vmatpush2.bf16.msra.mxu1 %v2535_v47  ;;  %v2574_v47 = vld [vmem:[#allocation14 + $0x64] ss:$8 sps:$4 sm:$0xff]  }
 0x1bf   :  { %1410 = vmatprep.subr.bf16.mxu1 %v2540_v48  ;;  %v2577_v48 = vld [vmem:[#allocation14 + $0x54] ss:$8 sps:$4 sm:$0xff]   ;;  %v2604_v19 = vld [vmem:[#allocation16 + $0x44] ss:$8 sps:$4 sm:$0xff]  }
 0x1c2   :  { %1411 = vmatpush2.bf16.msra.mxu1 %v2538_v49  ;;  %v2575_v49 = vld [vmem:[#allocation14 + $0x50] ss:$8 sps:$4 sm:$0xff]  }
 0x1c3   :  { %1412 = vmatprep.subr.bf16.mxu1 %v2543_v50  ;;  %v2580_v50 = vld [vmem:[#allocation14 + $0x44] ss:$8 sps:$4 sm:$0xff]  }
 0x1c6   :  { %1413 = vmatpush2.bf16.msra.mxu1 %v2541_v51  ;;  %v2578_v51 = vld [vmem:[#allocation14 + $0x40] ss:$8 sps:$4 sm:$0xff]  }
 0x1c7   :  { %1414 = vmatprep.subr.bf16.mxu1 %v2546_v52  ;;  %v2583_v52 = vld [vmem:[#allocation14 + $0x34] ss:$8 sps:$4 sm:$0xff]  }
 0x1ca   :  { %1415 = vmatpush2.bf16.msra.mxu1 %v2544_v53  ;;  %v2581_v53 = vld [vmem:[#allocation14 + $0x30] ss:$8 sps:$4 sm:$0xff]  }
 0x1cb   :  { %1416 = vmatprep.subr.bf16.mxu1 %v2549_v54  ;;  %v2586_v54 = vld [vmem:[#allocation14 + $0x24] ss:$8 sps:$4 sm:$0xff]  }
 0x1ce   :  { %1417 = vmatpush2.bf16.msra.mxu1 %v2547_v55  ;;  %v2584_v55 = vld [vmem:[#allocation14 + $0x20] ss:$8 sps:$4 sm:$0xff]  }
 0x1cf   :  { %1418 = vmatprep.subr.bf16.mxu1 %v2552_v56  ;;  %v1431_v56 = vlaneseq }
 0x1d2   :  { %1419 = vmatpush2.bf16.msra.mxu1 %v2550_v57  ;;  %v2990_v57 = vshrl.u32 %v1431_v56, 7 }
 0x1d3   :  { %1711 = vmatprep.subr.bf16.mxu1 %v2571_v46  ;;  %v2631_v46 = vld [vmem:[#allocation16 + $0xb4] ss:$8 sps:$4 sm:$0xff]  }
 0x1d4   :  { %v1437_v60 = vsub.s32 1, %v2990_v57 }
 0x215   :  { %v462_v10 = vpop.f32.mrf.mxu1 }
 0x216   :  { %v2066_v11 = vmul.f32 -1.442695, %v462_v10  ;;  %v2587_v10 = vld [vmem:[#allocation14 + $0x10] ss:$8 sps:$4 sm:$0xff]  }
 0x217   :  { %v464_v12 = vpop.f32.mrf.mxu1 }
 0x218   :  { %2641 = vpow2.f32 %v2066_v11  ;;  %v2067_v14 = vmul.f32 -1.442695, %v464_v12  ;;  %v2592_v11 = vld [vmem:[#allocation14 + $0x4] ss:$8 sps:$4 sm:$0xff]   ;;  %v2590_v12 = vld [vmem:[#allocation14] ss:$8 sps:$4 sm:$0xff]  }
 0x219   :  { %v466_v15 = vpop.f32.mrf.mxu1 }
 0x21a   :  { %2643 = vpow2.f32 %v2067_v14  ;;  %v2595_v14 = vld [vmem:[#allocation16 + $0x74] ss:$8 sps:$4 sm:$0xff]   ;;  %v2598_v15 = vld [vmem:[#allocation16 + $0x64] ss:$8 sps:$4 sm:$0xff]  }
 0x21b   :  { %v467_v17 = vpop.f32.mrf.mxu1  ;;  %1972 = vmatprep.subr.bf16.mxu0 %v2595_v14 }
 0x21c   :  { %v2601_v17 = vld [vmem:[#allocation16 + $0x54] ss:$8 sps:$4 sm:$0xff]  }
 0x225   :  { %v2642_v20 = vpop.eup %2641 }
 0x226   :  { %v475_v21 = vadd.f32 1.0, %v2642_v20  ;;  %v2602_v20 = vld [vmem:[#allocation16 + $0x40] ss:$8 sps:$4 sm:$0xff]  }
 0x227   :  { %v2644_v22 = vpop.eup %2643 }
 0x228   :  { %2645 = vrcp.f32 %v475_v21  ;;  %v476_v23 = vadd.f32 1.0, %v2644_v22  ;;  %v2607_v21 = vld [vmem:[#allocation16 + $0x34] ss:$8 sps:$4 sm:$0xff]   ;;  %v2605_v22 = vld [vmem:[#allocation16 + $0x30] ss:$8 sps:$4 sm:$0xff]  }
 0x22a   :  { %2647 = vrcp.f32 %v476_v23  ;;  %v2610_v23 = vld [vmem:[#allocation16 + $0x24] ss:$8 sps:$4 sm:$0xff]  }
 0x235   :  { %v2646_v24 = vpop.eup %2645 }
 0x236   :  { %v481_v27 = vmul.f32 %v2657_v26, %v2646_v24  ;;  %v2608_v24 = vld [vmem:[#allocation16 + $0x20] ss:$8 sps:$4 sm:$0xff]  }
 0x237   :  { %v2648_v25 = vpop.eup %2647 }
 0x238   :  { %v482_v29 = vmul.f32 %v2658_v28, %v2648_v25  ;;  %v489_v31 = vpack.c.bf16 %v481_v27, %v481_v27 }
 0x23a   :  { %v490_v30 = vpack.c.bf16 %v482_v29, %v482_v29 }
 0x23c   :  { %1420 = vmatprep.mubr.bf16.mxu1 %v490_v30 }
 0x23d   :  { %1421 = vmatmul.mubr.bf16.vlgmr.msra.gmra.mxu1 %v489_v31 }
 0x23e   :  { %1743 = vmatprep.mubr.bf16.mxu1 %v2884_v36  ;;  %1712 = vmatpush1.bf16.msra.mxu1 %v2569_v45  ;;  %v2572_v36 = vld [vmem:[#allocation14 + $0x60] ss:$8 sps:$4 sm:$0xff]   ;;  %v2629_v45 = vld [vmem:[#allocation16 + $0xb0] ss:$8 sps:$4 sm:$0xff]  }
 0x23f   :  { %1713 = vmatprep.subr.bf16.mxu1 %v2574_v47  ;;  %v2634_v47 = vld [vmem:[#allocation16 + $0xa4] ss:$8 sps:$4 sm:$0xff]  }
 0x242   :  { %1714 = vmatpush1.bf16.msra.mxu1 %v2572_v36  ;;  %v2632_v36 = vld [vmem:[#allocation16 + $0xa0] ss:$8 sps:$4 sm:$0xff]  }
 0x243   :  { %1715 = vmatprep.subr.bf16.mxu1 %v2577_v48  ;;  %v2637_v48 = vld [vmem:[#allocation16 + $0x94] ss:$8 sps:$4 sm:$0xff]  }
 0x246   :  { %1716 = vmatpush1.bf16.msra.mxu1 %v2575_v49  ;;  %v2635_v49 = vld [vmem:[#allocation16 + $0x90] ss:$8 sps:$4 sm:$0xff]  }
 0x247   :  { %1717 = vmatprep.subr.bf16.mxu1 %v2580_v50  ;;  %v2640_v50 = vld [vmem:[#allocation16 + $0x84] ss:$8 sps:$4 sm:$0xff]  }
 0x24a   :  { %1718 = vmatpush1.bf16.msra.mxu1 %v2578_v51  ;;  %v2638_v51 = vld [vmem:[#allocation16 + $0x80] ss:$8 sps:$4 sm:$0xff]  }
 0x24b   :  { %1719 = vmatprep.subr.bf16.mxu1 %v2583_v52 }
 0x24e   :  { %1720 = vmatpush1.bf16.msra.mxu1 %v2581_v53 }
 0x24f   :  { %1721 = vmatprep.subr.bf16.mxu1 %v2586_v54 }
 0x252   :  { %1722 = vmatpush1.bf16.msra.mxu1 %v2584_v55 }
 0x253   :  { %1723 = vmatprep.subr.bf16.mxu1 %v2589_v9  ;;  %v1800_v9 = vld [vmem:[%s3031_s10] sm:$0x3] }
 0x255   :  { %v1180_v32 = vpop.f32.mrf.mxu1 }
 0x256   :  { %v1181_v33 = vadd.f32 %v1180_v32, %v1139_v58  ;;  %v1433_v58 = vsub.s32 0, %v2990_v57  ;;  %1724 = vmatpush1.bf16.msra.mxu1 %v2587_v10  ;;  %v2613_v32 = vld [vmem:[#allocation16 + $0x14] ss:$8 sps:$4 sm:$0xff]  }
 0x257   :  { %v1182_v34 = vpop.f32.mrf.mxu1  ;;  %1725 = vmatprep.subr.bf16.mxu1 %v2592_v11  ;;  %v1809_v11 = vrot.slane %v1800_v9, %v1437_v60 }
 0x258   :  { %v1183_v35 = vadd.f32 %v1182_v34, %v1141_v59  ;;  %v1222_v37 = vadd.f32 %v1221_v13, %v1181_v33  ;;  %v1429_v59 = vld [vmem:[%s3027_s6] sm:$0x3]  ;;  %v2593_v13 = vld [vmem:[#allocation16 + $0x70] ss:$8 sps:$4 sm:$0xff]   ;;  %v2616_v34 = vld [vmem:[#allocation16 + $0x4] ss:$8 sps:$4 sm:$0xff]   ;;  %v1805_v10 = vrot.slane %v1800_v9, %v1433_v58 }
 0x259   :  { %v1184_v38 = vpop.f32.mrf.mxu1  ;;  %v1434_v62 = vrot.slane %v1429_v59, %v1433_v58  ;;  %v1438_v0 = vrot.slane %v1429_v59, %v1437_v60  ;;  %v2611_v33 = vld [vmem:[#allocation16 + $0x10] ss:$8 sps:$4 sm:$0xff]  }
 0x25a   :  { %v1224_v39 = vadd.f32 %v1223_v16, %v1183_v35  ;;  %1726 = vmatpush1.bf16.msra.mxu1 %v2590_v12  ;;  %v2596_v16 = vld [vmem:[#allocation16 + $0x60] ss:$8 sps:$4 sm:$0xff]   ;;  %v2617_v38 = vld [vmem:[#allocation16 + $0xf0] ss:$8 sps:$4 sm:$0xff]  }
 0x25b   :  { %v1185_v40 = vpop.f32.mrf.mxu1  ;;  %v2614_v35 = vld [vmem:[#allocation16] ss:$8 sps:$4 sm:$0xff]  }
 0x25c   :  { %v2620_v40 = vld [vmem:[#allocation16 + $0xe0] ss:$8 sps:$4 sm:$0xff]  }
 0x2fd   :  { %v1422_v61 = vpop.f32.mrf.mxu1 }
 0x2fe   :  { %v1423_v63 = vadd.f32 %v1422_v61, %v1222_v37  ;;  %v2619_v37 = vld [vmem:[#allocation16 + $0xf4] ss:$8 sps:$4 sm:$0xff]  }
 0x2ff   :  { %v1424_v1 = vpop.f32.mrf.mxu1 }
 0x300   :  { %v1425_v2 = vadd.f32 %v1424_v1, %v1224_v39  ;;  %v3001_v3 = vadd.f32 %v1434_v62, %v1423_v63  ;;  %v2622_v39 = vld [vmem:[#allocation16 + $0xe4] ss:$8 sps:$4 sm:$0xff]  }
 0x301   :  { %v1426_v4 = vpop.f32.mrf.mxu1 }
 0x302   :  { %v3003_v5 = vadd.f32 %v1438_v0, %v1425_v2  ;;  %v1443_v8 = vpack.c.bf16 %v3001_v3, %v3001_v3 }
 0x303   :  { %v1427_v6 = vpop.f32.mrf.mxu1 }
 0x304   :  { %v1444_v7 = vpack.c.bf16 %v3003_v5, %v3003_v5 }
 0x306   :  { %1605 = vmatprep.mubr.bf16.mxu0 %v1444_v7 }
 0x307   :  { %1606 = vmatmul.mubr.bf16.vlgmr.msra.gmra.mxu0 %v1443_v8 }
 0x308   :  { %1973 = vmatpush1.bf16.msra.mxu0 %v2593_v13 }
 0x309   :  { %1974 = vmatprep.subr.bf16.mxu0 %v2598_v15 }
 0x30c   :  { %1975 = vmatpush1.bf16.msra.mxu0 %v2596_v16 }
 0x30d   :  { %1976 = vmatprep.subr.bf16.mxu0 %v2601_v17 }
 0x310   :  { %1977 = vmatpush1.bf16.msra.mxu0 %v2599_v18 }
 0x311   :  { %1978 = vmatprep.subr.bf16.mxu0 %v2604_v19 }
 0x314   :  { %1979 = vmatpush1.bf16.msra.mxu0 %v2602_v20 }
 0x315   :  { %1980 = vmatprep.subr.bf16.mxu0 %v2607_v21 }
 0x318   :  { %1981 = vmatpush1.bf16.msra.mxu0 %v2605_v22 }
 0x319   :  { %1982 = vmatprep.subr.bf16.mxu0 %v2610_v23 }
 0x31c   :  { %1983 = vmatpush1.bf16.msra.mxu0 %v2608_v24 }
 0x31d   :  { %1984 = vmatprep.subr.bf16.mxu0 %v2613_v32 }
 0x320   :  { %1985 = vmatpush1.bf16.msra.mxu0 %v2611_v33 }
 0x321   :  { %1986 = vmatprep.subr.bf16.mxu0 %v2616_v34 }
 0x324   :  { %1987 = vmatpush1.bf16.msra.mxu0 %v2614_v35 }
 0x325   :  { %1988 = vmatprep.subr.bf16.mxu0 %v2619_v37 }
 0x328   :  { %1989 = vmatpush2.bf16.msra.mxu0 %v2617_v38 }
 0x329   :  { %1990 = vmatprep.subr.bf16.mxu0 %v2622_v39 }
 0x32c   :  { %1991 = vmatpush2.bf16.msra.mxu0 %v2620_v40 }
 0x32d   :  { %1992 = vmatprep.subr.bf16.mxu0 %v2625_v41 }
 0x330   :  { %1993 = vmatpush2.bf16.msra.mxu0 %v2623_v42 }
 0x331   :  { %1994 = vmatprep.subr.bf16.mxu0 %v2628_v43 }
 0x334   :  { %1995 = vmatpush2.bf16.msra.mxu0 %v2626_v44 }
 0x335   :  { %1996 = vmatprep.subr.bf16.mxu0 %v2631_v46 }
 0x338   :  { %1997 = vmatpush2.bf16.msra.mxu0 %v2629_v45 }
 0x339   :  { %1998 = vmatprep.subr.bf16.mxu0 %v2634_v47 }
 0x33c   :  { %1999 = vmatpush2.bf16.msra.mxu0 %v2632_v36 }
 0x33d   :  { %2000 = vmatprep.subr.bf16.mxu0 %v2637_v48 }
 0x340   :  { %2001 = vmatpush2.bf16.msra.mxu0 %v2635_v49 }
 0x341   :  { %2002 = vmatprep.subr.bf16.mxu0 %v2640_v50 }
 0x344   :  { %2003 = vmatpush2.bf16.msra.mxu0 %v2638_v51 }
 0x3c7   :  { %v2300_v25 = vpop.f32.mrf.mxu0 }
 0x3c9   :  { %v2301_v26 = vpop.f32.mrf.mxu0 }
 0x3ca   :  { %v2302_v27 = vadd.f32 %v2301_v26, %v2300_v25 }
 0x3cb   :  { %v2303_v28 = vpop.f32.mrf.mxu0 }
 0x3cc   :  { %v1613_v29 = vmax.f32 %v2302_v27, 0.0 }
 0x3cd   :  { %v2304_v30 = vpop.f32.mrf.mxu0 }
 0x3ce   :  { %v1614_v31 = vpack.c.bf16 %v1613_v29, %v1613_v29 }
 0x3d0   :  { %1744 = vmatmul.mubr.bf16.vlgmr.msra.gmra.mxu1 %v1614_v31 }
 0x490   :  { %v1745_v52 = vpop.f32.mrf.mxu1 }
 0x491   :  { %v2228_v53 = vmul.f32 -1.442695, %v1745_v52 }
 0x492   :  { %v1747_v54 = vpop.f32.mrf.mxu1 }
 0x493   :  { %2649 = vpow2.f32 %v2228_v53  ;;  %v2229_v55 = vmul.f32 -1.442695, %v1747_v54 }
 0x494   :  { %v1749_v56 = vpop.f32.mrf.mxu1 }
 0x495   :  { %2651 = vpow2.f32 %v2229_v55 }
 0x496   :  { %v1750_v59 = vpop.f32.mrf.mxu1 }
 0x4a0   :  { %v2650_v61 = vpop.eup %2649 }
 0x4a1   :  { %v1758_v62 = vadd.f32 1.0, %v2650_v61 }
 0x4a2   :  { %v2652_v63 = vpop.eup %2651 }
 0x4a3   :  { %2653 = vrcp.f32 %v1758_v62  ;;  %v1759_v0 = vadd.f32 1.0, %v2652_v63 }
 0x4a5   :  { %2655 = vrcp.f32 %v1759_v0 }
 0x4b0   :  { %v2654_v1 = vpop.eup %2653 }
 0x4b1   :  { %v1764_v4 = vmul.f32 %v2654_v1, %v3001_v3 }
 0x4b2   :  { %v2656_v2 = vpop.eup %2655 }
 0x4b3   :  { %v1765_v6 = vmul.f32 %v2656_v2, %v3003_v5  ;;  %v1766_v8 = vpack.c.bf16 %v1764_v4, %v1764_v4 }
 0x4b5   :  { %v1767_v7 = vpack.c.bf16 %v1765_v6, %v1765_v6 }
 0x4b7   :  { %2004 = vmatprep.mubr.bf16.mxu0 %v1767_v7 }
 0x4b8   :  { %2005 = vmatmul.mubr.bf16.vlgmr.msra.gmra.mxu0 %v1766_v8 }
 0x578   :  { %v2006_v12 = vpop.f32.mrf.mxu0 }
 0x579   :  { %v2007_v3 = vadd.f32 %v2006_v12, %v1805_v10 }
 0x57a   :  { %v2008_v13 = vpop.f32.mrf.mxu0 }
 0x57b   :  { %2013 = vst [vmem:[#allocation17] sm:$0xff] %v2007_v3  ;;  %v2009_v5 = vadd.f32 %v2008_v13, %v1809_v11 }
 0x57c   :  { %v2010_v14 = vpop.f32.mrf.mxu0 }
 0x57d   :  { %2014 = vst [vmem:[#allocation17 + $0x8] sm:$0xff] %v2009_v5 }
 0x57e   :  { %v2011_v15 = vpop.f32.mrf.mxu0 }
 0x57f   :  { %2850 = shalt.err (!%p2847_p7)
}
 0x580   :  { %2024 = dma.vmem_to_hbm [thread:$0]  %s2022_s21, 256, %s3032_s11, [#allocation4]  }
 0x581   :  { %2869 = dma.done.wait [#allocation4], 256  }
 0x582   :  { %2870 = vsyncadd [#allocation4], 4294967040 }
 0x583   :  { %2028 = vsyncpa [#allocation3], 1 }
 0x584   :  { %2029 = vsyncpa [#allocation6], 1 }
 0x585   :  { %2030 = vsyncpa [#allocation9], 1 }
 0x586   :  { %2031 = vsyncpa [#allocation12], 1 }
 0x587   :  { %2032 = vsyncpa [#allocation15], 1 }
 0x588   :  { %2033 = vsyncpa [#allocation4], 1 }

</bundles_post_ra>
